<compile_context>
chip_gen: v5e
topology: v5e:2x2
jax: 0.10.0
libtpu: 0.0.40
codegen_flags: <defaults>
</compile_context>

<pallas_src>
import functools

import jax
import jax.numpy as jnp
import numpy as np
from jax.experimental import pallas as pl
from jax.experimental.pallas import tpu as pltpu

_LANE = 128
_MiB = 2 ** 20
_NEG_BIG = -1e30          # folded column mask for the final log_softmax


# ----------------------------------------------------------------------------
# Small helpers
# ----------------------------------------------------------------------------
def _round_up(x, m):
    return ((x + m - 1) // m) * m


def _pad_to(a, shape, fill=0.0):
    return jnp.pad(a, [(0, s - d) for s, d in zip(shape, a.shape)],
                   constant_values=fill)


def _tpu_config():
    """(per-core VMEM capacity bytes, multi-TensorCore chip?) with fallbacks."""
    kind = ""
    try:
        kind = jax.devices()[0].device_kind.lower()
    except Exception:
        pass
    multi_tc = any(tag in kind for tag in ("v7", "7x", "v4"))
    vmem_cap = None
    try:
        vmem_cap = int(pltpu.get_tpu_info().vmem_capacity_bytes)
    except Exception:
        vmem_cap = None
    if vmem_cap is None:
        vmem_cap = 64 * _MiB if multi_tc else 128 * _MiB
    return vmem_cap, multi_tc


def _vmem_estimate(project_first, tm, tk, f_in_pad, f_out_pad,
                   adj_bytes, feat_bytes, w_bytes):
    """Per-call VMEM footprint incl. scratch and in-kernel f32 temporaries."""
    est = 2 * 2 * tm * tk * adj_bytes                 # A_s, A_d blocks (x2 buf)
    est += 2 * tm * f_out_pad * 4                     # output block
    est += 2 * 8 * f_out_pad * 4                      # bias (sublane padded)
    if project_first:
        est += 2 * 2 * tk * f_out_pad * feat_bytes    # Y_s, Y_d blocks
        est += tm * f_out_pad * 4                     # f32 accumulator scratch
        est += 3 * tm * f_out_pad * 4                 # f32 temporaries
    else:
        est += 2 * tk * f_in_pad * feat_bytes         # x block
        est += 2 * 2 * f_in_pad * f_out_pad * w_bytes  # W_s, W_d
        est += 2 * tm * f_in_pad * 4                  # f32 accumulators hs, hd
        est += 2 * tm * f_in_pad * 4 + 3 * tm * f_out_pad * 4  # temporaries
    return est


def _choose_tiling(n_pad, *, project_first, f_in_pad, f_out_pad,
                   adj_bytes, feat_bytes, w_bytes, budget, multi_tc):
    """Largest (row tile, reduction tile) that fits the VMEM budget."""
    tm_cap = 512 if multi_tc else 2048
    tm_cands = [t for t in (2048, 1024, 512, 256, 128, 64, 32, 16, 8)
                if t <= min(n_pad, tm_cap) and n_pad % t == 0]
    if multi_tc:
        # Keep >= 2 row tiles so the "parallel" axis can shard across the
        # two TensorCores (v7x) / megacore (v4).
        two_step = [t for t in tm_cands if n_pad // t >= 2]
        if two_step:
            tm_cands = two_step
    tk_cands = [t for t in (n_pad, 8192, 4096, 2048, 1024, 512, 256, 128)
                if t <= n_pad and n_pad % t == 0]
    tk_cands = list(dict.fromkeys(tk_cands))
    for tm in tm_cands:
        for tk in tk_cands:
            if _vmem_estimate(project_first, tm, tk, f_in_pad, f_out_pad,
                              adj_bytes, feat_bytes, w_bytes) <= budget:
                return tm, tk
    return tm_cands[-1], tk_cands[-1]


# ----------------------------------------------------------------------------
# Single-buffered specs for grid-invariant operands (with safe fallback)
# ----------------------------------------------------------------------------
_SINGLE_BUFFER_OK = [True]


def _const_spec(shape, single_buffer):
    idx = lambda *_: tuple(0 for _d in shape)
    if single_buffer:
        # Grid-invariant operand: a second pipeline buffer only wastes VMEM.
        return pl.BlockSpec(shape, idx, pipeline_mode=pl.Buffered(1))
    return pl.BlockSpec(shape, idx)


def _call_with_fallback(builder, args):
    """Try single-buffered invariant operands; fall back if unsupported."""
    if _SINGLE_BUFFER_OK[0]:
        try:
            return builder(True)(*args)
        except Exception:
            _SINGLE_BUFFER_OK[0] = False
    return builder(False)(*args)


# ----------------------------------------------------------------------------
# Kernel bodies
# ----------------------------------------------------------------------------
def _epilogue(out, apply_relu, apply_log_softmax):
    if apply_relu:
        out = jnp.maximum(out, 0.0)
    if apply_log_softmax:
        # Padded columns carry a ~-1e30 bias, so no explicit column mask.
        m = jnp.max(out, axis=-1, keepdims=True)
        s = jnp.sum(jnp.exp(out - m), axis=-1, keepdims=True)
        out = out - (m + jnp.log(s))
    return out


def _agg_first_kernel(a_s_ref, a_d_ref, x_ref, ws_ref, wd_ref, b_ref, o_ref,
                      acc_s_ref, acc_d_ref, *, apply_relu, apply_log_softmax):
    """Aggregate-first: hs += A_s@x, hd += A_d@x; finalize hs@W_s + hd@W_d."""
    k = pl.program_id(1)

    @pl.when(k == 0)
    def _():
        acc_s_ref[...] = jnp.zeros_like(acc_s_ref)
        acc_d_ref[...] = jnp.zeros_like(acc_d_ref)

    x = x_ref[...]
    acc_s_ref[...] += jnp.dot(a_s_ref[...], x,
                              preferred_element_type=jnp.float32)
    acc_d_ref[...] += jnp.dot(a_d_ref[...], x,
                              preferred_element_type=jnp.float32)

    @pl.when(k == pl.num_programs(1) - 1)
    def _():
        w_s = ws_ref[...]
        w_d = wd_ref[...]
        # Two accumulating dots (no concat / K=2F relayout); MXU inputs in the
        # streaming dtype, f32 accumulation.
        out = jnp.dot(acc_s_ref[...].astype(w_s.dtype), w_s,
                      preferred_element_type=jnp.float32)
        out = out + jnp.dot(acc_d_ref[...].astype(w_d.dtype), w_d,
                            preferred_element_type=jnp.float32)
        out = _epilogue(out + b_ref[...], apply_relu, apply_log_softmax)
        o_ref[...] = out.astype(o_ref.dtype)


def _proj_first_kernel(a_s_ref, a_d_ref, ys_ref, yd_ref, b_ref, o_ref,
                       acc_ref, *, apply_relu, apply_log_softmax):
    """Project-first: acc += A_s@Y_s + A_d@Y_d; finalize acc + b."""
    k = pl.program_id(1)

    @pl.when(k == 0)
    def _():
        acc_ref[...] = jnp.zeros_like(acc_ref)

    acc_ref[...] += (
        jnp.dot(a_s_ref[...], ys_ref[...], preferred_element_type=jnp.float32)
        + jnp.dot(a_d_ref[...], yd_ref[...],
                  preferred_element_type=jnp.float32))

    @pl.when(k == pl.num_programs(1) - 1)
    def _():
        out = _epilogue(acc_ref[...] + b_ref[...],
                        apply_relu, apply_log_softmax)
        o_ref[...] = out.astype(o_ref.dtype)


def _projection_kernel(x_ref, ws_ref, wd_ref, ys_ref, yd_ref):
    """Y_s = X @ W_s, Y_d = X @ W_d (per row tile)."""
    x = x_ref[...]
    ys_ref[...] = jnp.dot(x, ws_ref[...],
                          preferred_element_type=jnp.float32).astype(ys_ref.dtype)
    yd_ref[...] = jnp.dot(x, wd_ref[...],
                          preferred_element_type=jnp.float32).astype(yd_ref.dtype)


# ----------------------------------------------------------------------------
# pallas_call wrappers
# ----------------------------------------------------------------------------
def _layer_aggregate_first(a_s, a_d, h, ws, wd, b_fold, *, tm, tk, out_dtype,
                           apply_relu, apply_log_softmax, vmem_limit):
    n_pad = a_s.shape[0]
    f_in_pad = h.shape[1]
    f_out_pad = ws.shape[1]
    kernel = functools.partial(_agg_first_kernel, apply_relu=apply_relu,
                               apply_log_softmax=apply_log_softmax)

    def builder(single):
        adj_spec = pl.BlockSpec((tm, tk), lambda i, k: (i, k))
        return pl.pallas_call(
            kernel,
            out_shape=jax.ShapeDtypeStruct((n_pad, f_out_pad), out_dtype),
            grid_spec=pltpu.PrefetchScalarGridSpec(
                num_scalar_prefetch=0,
                grid=(n_pad // tm, n_pad // tk),
                in_specs=[
                    adj_spec, adj_spec,                            # A_s, A_d
                    pl.BlockSpec((tk, f_in_pad), lambda i, k: (k, 0)),  # x
                    _const_spec((f_in_pad, f_out_pad), single),    # W_s
                    _const_spec((f_in_pad, f_out_pad), single),    # W_d
                    _const_spec((1, f_out_pad), single),           # bias
                ],
                out_specs=pl.BlockSpec((tm, f_out_pad), lambda i, k: (i, 0)),
                scratch_shapes=[pltpu.VMEM((tm, f_in_pad), jnp.float32),
                                pltpu.VMEM((tm, f_in_pad), jnp.float32)]),
            compiler_params=pltpu.CompilerParams(
                dimension_semantics=("parallel", "arbitrary"),
                vmem_limit_bytes=vmem_limit))

    return _call_with_fallback(builder, (a_s, a_d, h, ws, wd, b_fold))


def _layer_project_first(a_s, a_d, y_s, y_d, b_fold, *, tm, tk, out_dtype,
                         apply_relu, apply_log_softmax, vmem_limit):
    n_pad = a_s.shape[0]
    f_out_pad = y_s.shape[1]
    kernel = functools.partial(_proj_first_kernel, apply_relu=apply_relu,
                               apply_log_softmax=apply_log_softmax)

    def builder(single):
        adj_spec = pl.BlockSpec((tm, tk), lambda i, k: (i, k))
        y_spec = pl.BlockSpec((tk, f_out_pad), lambda i, k: (k, 0))
        return pl.pallas_call(
            kernel,
            out_shape=jax.ShapeDtypeStruct((n_pad, f_out_pad), out_dtype),
            grid_spec=pltpu.PrefetchScalarGridSpec(
                num_scalar_prefetch=0,
                grid=(n_pad // tm, n_pad // tk),
                in_specs=[adj_spec, adj_spec, y_spec, y_spec,
                          _const_spec((1, f_out_pad), single)],
                out_specs=pl.BlockSpec((tm, f_out_pad), lambda i, k: (i, 0)),
                scratch_shapes=[pltpu.VMEM((tm, f_out_pad), jnp.float32)]),
            compiler_params=pltpu.CompilerParams(
                dimension_semantics=("parallel", "arbitrary"),
                vmem_limit_bytes=vmem_limit))

    return _call_with_fallback(builder, (a_s, a_d, y_s, y_d, b_fold))


def _project(h, ws, wd, *, out_dtype, vmem_limit):
    """Y_s = h @ W_s, Y_d = h @ W_d in one row-tiled pass."""
    n_pad, f_in_pad = h.shape
    f_out_pad = ws.shape[1]
    tp = _LANE                                  # n_pad is a multiple of 128

    def builder(single):
        return pl.pallas_call(
            _projection_kernel,
            out_shape=(jax.ShapeDtypeStruct((n_pad, f_out_pad), out_dtype),
                       jax.ShapeDtypeStruct((n_pad, f_out_pad), out_dtype)),
            grid_spec=pltpu.PrefetchScalarGridSpec(
                num_scalar_prefetch=0,
                grid=(n_pad // tp,),
                in_specs=[pl.BlockSpec((tp, f_in_pad), lambda i: (i, 0)),
                          _const_spec((f_in_pad, f_out_pad), single),
                          _const_spec((f_in_pad, f_out_pad), single)],
                out_specs=[pl.BlockSpec((tp, f_out_pad), lambda i: (i, 0)),
                           pl.BlockSpec((tp, f_out_pad), lambda i: (i, 0))]),
            compiler_params=pltpu.CompilerParams(
                dimension_semantics=("parallel",),
                vmem_limit_bytes=vmem_limit))

    return _call_with_fallback(builder, (h, ws, wd))


# ----------------------------------------------------------------------------
# Graph preprocessing (plain JAX, done once — as in the PyTorch module)
# ----------------------------------------------------------------------------
def dir_norm(adj):
    """get_norm_adj(adj, norm='dir')  ==  D_out^{-1/2} A D_in^{-1/2}."""
    out_deg = adj.sum(axis=1)
    in_deg = adj.sum(axis=0)
    out_inv = jnp.where(out_deg > 0, 1.0 / jnp.sqrt(out_deg), 0.0)
    in_inv = jnp.where(in_deg > 0, 1.0 / jnp.sqrt(in_deg), 0.0)
    return out_inv[:, None] * adj * in_inv[None, :]


def build_adjacencies(edge_index, num_nodes):
    row, col = edge_index
    adj = jnp.zeros((num_nodes, num_nodes), jnp.float32).at[row, col].set(1.0)
    adj_t = adj.T
    eye_mask = 1.0 - jnp.eye(num_nodes, dtype=jnp.float32)

    so_in = adj_t @ adj
    so_in = jnp.where(adj_t > 0, 0.0, so_in) * eye_mask
    so_out = adj @ adj_t
    so_out = jnp.where(adj > 0, 0.0, so_out) * eye_mask

    return dir_norm(adj), dir_norm(adj_t), dir_norm(so_out), dir_norm(so_in)


# ----------------------------------------------------------------------------
# Full GNN forward (stacked DirGCNConv + ReLU + log_softmax)
# ----------------------------------------------------------------------------
def gnn_forward(x, edge_index, layer_params, *, alpha1, alpha2, beta1,
                compute_dtype=jnp.bfloat16, adj_dtype=None):
    """compute_dtype: streaming / MXU-input dtype for adjacencies, features and
    weights (accumulation is always f32); bf16 is recommended on v5e/v6e/v7x.
    adj_dtype: optional override to keep the degree-normalized adjacencies in
    f32 when that precision matters more than DMA bytes."""
    if adj_dtype is None:
        adj_dtype = compute_dtype
    num_nodes, f_in0 = x.shape
    adj_norm, adj_t_norm, so_out, so_in = build_adjacencies(edge_index,
                                                            num_nodes)

    c1 = float(beta1 * alpha1)
    c2 = float(beta1 * (1.0 - alpha1))
    c3 = float((1.0 - beta1) * alpha2)
    c4 = float((1.0 - beta1) * (1.0 - alpha2))

    # Fold the scalar mix into TWO adjacencies (half the adjacency traffic).
    a_s = c1 * adj_norm + c3 * so_out      # feeds lin_src_to_dst
    a_d = c2 * adj_t_norm + c4 * so_in     # feeds lin_dst_to_src

    n_pad = _round_up(num_nodes, _LANE)            # lane-aligned node padding
    vmem_cap, multi_tc = _tpu_config()
    budget = (vmem_cap * 3) // 4       # same number drives tiling + vmem limit

    a_s = _pad_to(a_s, (n_pad, n_pad)).astype(adj_dtype)
    a_d = _pad_to(a_d, (n_pad, n_pad)).astype(adj_dtype)
    h = _pad_to(x, (n_pad, _round_up(f_in0, _LANE))).astype(compute_dtype)

    adj_bytes = jnp.dtype(adj_dtype).itemsize
    feat_bytes = jnp.dtype(compute_dtype).itemsize
    w_bytes = feat_bytes

    num_layers = len(layer_params)
    for li, (w_s, b_s, w_d, b_d) in enumerate(layer_params):
        f_in, f_out = w_s.shape
        f_in_pad = _round_up(f_in, _LANE)
        f_out_pad = _round_up(f_out, _LANE)
        assert h.shape == (n_pad, f_in_pad)
        last = li == num_layers - 1

        ws_pad = _pad_to(w_s, (f_in_pad, f_out_pad)).astype(compute_dtype)
        wd_pad = _pad_to(w_d, (f_in_pad, f_out_pad)).astype(compute_dtype)
        # Pre-folded bias; the last layer's padded columns carry a large
        # negative value so the fused log_softmax needs no column mask.
        b_fold = _pad_to((c1 + c3) * b_s + (c2 + c4) * b_d, (1, f_out_pad),
                         fill=_NEG_BIG if last else 0.0).astype(jnp.float32)

        project_first = f_out_pad < f_in_pad
        out_dtype = jnp.float32 if last else compute_dtype
        tm, tk = _choose_tiling(n_pad, project_first=project_first,
                                f_in_pad=f_in_pad, f_out_pad=f_out_pad,
                                adj_bytes=adj_bytes, feat_bytes=feat_bytes,
                                w_bytes=w_bytes, budget=budget,
                                multi_tc=multi_tc)
        est = _vmem_estimate(project_first, tm, tk, f_in_pad, f_out_pad,
                             adj_bytes, feat_bytes, w_bytes)
        vmem_limit = int(min(budget, max(32 * _MiB, 2 * est)))

        if project_first:
            # out = A_s@(h W_s) + A_d@(h W_d) + b — identical by associativity,
            # but the N^2-scaling aggregation contracts into F_out_pad.
            y_s, y_d = _project(h, ws_pad, wd_pad, out_dtype=compute_dtype,
                                vmem_limit=vmem_limit)
            h = _layer_project_first(
                a_s, a_d, y_s, y_d, b_fold, tm=tm, tk=tk, out_dtype=out_dtype,
                apply_relu=not last, apply_log_softmax=last,
                vmem_limit=vmem_limit)
        else:
            h = _layer_aggregate_first(
                a_s, a_d, h, ws_pad, wd_pad, b_fold, tm=tm, tk=tk,
                out_dtype=out_dtype, apply_relu=not last,
                apply_log_softmax=last, vmem_limit=vmem_limit)
        # NOTE: padded node rows of `h` hold relu(b_fold) != 0; this is safe
        # only because the corresponding padded adjacency columns are zero.

    return h[:num_nodes, :layer_params[-1][0].shape[1]]


# ----------------------------------------------------------------------------
# Parameter init (PyTorch nn.Linear-style) and pure-JAX reference
# ----------------------------------------------------------------------------
def init_linear(key, in_dim, out_dim):
    kw, kb = jax.random.split(key)
    bound = 1.0 / np.sqrt(in_dim)
    w = jax.random.uniform(kw, (out_dim, in_dim), jnp.float32, -bound, bound)
    b = jax.random.uniform(kb, (out_dim,), jnp.float32, -bound, bound)
    return w.T, b.reshape(1, out_dim)       # y = x @ W.T + b


def dirgcn_reference(adjs, x, w_s, b_s, w_d, b_d, a1, a2, b1):
    adj_norm, adj_t_norm, so_out, so_in = adjs
    lin_s = lambda h: h @ w_s + b_s
    lin_d = lambda h: h @ w_d + b_d
    return (b1 * (a1 * lin_s(adj_norm @ x) + (1 - a1) * lin_d(adj_t_norm @ x))
            + (1 - b1) * (a2 * lin_s(so_out @ x)
                          + (1 - a2) * lin_d(so_in @ x)))


def gnn_reference(adjs, x, layer_params, a1, a2, b1):
    h = x
    for li, (w_s, b_s, w_d, b_d) in enumerate(layer_params):
        h = dirgcn_reference(adjs, h, w_s, b_s, w_d, b_d, a1, a2, b1)
        if li != len(layer_params) - 1:
            h = jnp.maximum(h, 0.0)        # relu; dropout=0 -> identity
    return jax.nn.log_softmax(h, axis=1)


# ----------------------------------------------------------------------------
if __name__ == "__main__":
    N = 64            # num_nodes            -> n_pad = 128
    F_IN = 200        # num_features         -> pads to 256 (project-first L1)
    HIDDEN = 32       # hidden_dim           -> pads to 128 (aggregate-first L2)
    NUM_CLASSES = 8
    NUM_EDGES = 256
    alpha1, alpha2, beta1 = 0.5, 0.5, 0.7

    key = jax.random.PRNGKey(0)
    kx, ke1, ke2, k1, k2 = jax.random.split(key, 5)

    x = jax.random.normal(kx, (N, F_IN), jnp.float32)
    row = jax.random.randint(ke1, (NUM_EDGES,), 0, N)
    col = jax.random.randint(ke2, (NUM_EDGES,), 0, N)
    edge_index = (row, col)

    # Two DirGCNConv layers: F_IN -> HIDDEN -> NUM_CLASSES.
    k1a, k1b = jax.random.split(k1)
    k2a, k2b = jax.random.split(k2)
    layer_params = [
        (*init_linear(k1a, F_IN, HIDDEN), *init_linear(k1b, F_IN, HIDDEN)),
        (*init_linear(k2a, HIDDEN, NUM_CLASSES),
         *init_linear(k2b, HIDDEN, NUM_CLASSES)),
    ]

    # Reference (mirrors the PyTorch forward).
    adjs = build_adjacencies(edge_index, N)
    ref = gnn_reference(adjs, x, layer_params, alpha1, alpha2, beta1)

    # f32 path (tight check; exercises both kernel modes).
    out_f32 = gnn_forward(x, edge_index, layer_params,
                          alpha1=alpha1, alpha2=alpha2, beta1=beta1,
                          compute_dtype=jnp.float32)
    out_f32 = jax.block_until_ready(out_f32)
    np.testing.assert_allclose(np.asarray(out_f32), np.asarray(ref),
                               rtol=1e-3, atol=1e-3)

    # Default bf16 streaming / bf16 MXU-input path (loose check).
    out_bf16 = gnn_forward(x, edge_index, layer_params,
                           alpha1=alpha1, alpha2=alpha2, beta1=beta1,
                           compute_dtype=jnp.bfloat16)
    out_bf16 = jax.block_until_ready(out_bf16)
    np.testing.assert_allclose(np.asarray(out_bf16), np.asarray(ref),
                               rtol=1e-1, atol=1e-1)

    print("KERNEL_OK")
</pallas_src>

<mosaic_0001>
module attributes {stable_mosaic.version = 11 : i64} {
  func.func @_projection_kernel(%arg0: i32, %arg1: memref<128x256xf32, #tpu.memory_space<vmem>>, %arg2: memref<256x128xf32, #tpu.memory_space<vmem>>, %arg3: memref<256x128xf32, #tpu.memory_space<vmem>>, %arg4: memref<128x128xf32, #tpu.memory_space<vmem>>, %arg5: memref<128x128xf32, #tpu.memory_space<vmem>>) attributes {dimension_semantics = [#tpu.dimension_semantics<parallel>], iteration_bounds = array<i64: 1>, scalar_prefetch = 0 : i64, scratch_operands = 0 : i64, tpu.core_type = #tpu.core_type<tc>, window_params = [{transform_indices = @transform_0, window_bounds = array<i64: 128, 256>}, {pipeline_mode = #tpu.pipeline_mode<synchronous>, transform_indices = @transform_1, window_bounds = array<i64: 256, 128>}, {pipeline_mode = #tpu.pipeline_mode<synchronous>, transform_indices = @transform_2, window_bounds = array<i64: 256, 128>}, {transform_indices = @transform_3, window_bounds = array<i64: 128, 128>}, {transform_indices = @transform_4, window_bounds = array<i64: 128, 128>}]} {
    %c0 = arith.constant 0 : index
    %c0_0 = arith.constant 0 : index
    %0 = vector.load %arg1[%c0, %c0_0] : memref<128x256xf32, #tpu.memory_space<vmem>>, vector<128x256xf32>
    %c0_1 = arith.constant 0 : index
    %c0_2 = arith.constant 0 : index
    %1 = vector.load %arg2[%c0_1, %c0_2] : memref<256x128xf32, #tpu.memory_space<vmem>>, vector<256x128xf32>
    %cst = arith.constant dense<0.000000e+00> : vector<128x128xf32>
    %2 = tpu.matmul %0, %1, %cst {dimension_numbers = #tpu.dot_dimension_numbers<[1], [0], [0], [1], [0, 0, 1, 1], [], []>} : vector<128x256xf32>, vector<256x128xf32>, vector<128x128xf32> -> vector<128x128xf32>
    %c0_3 = arith.constant 0 : index
    %c0_4 = arith.constant 0 : index
    %3 = vector.load %arg4[%c0_3, %c0_4] : memref<128x128xf32, #tpu.memory_space<vmem>>, vector<128x128xf32>
    tpu.vector_store %arg4[%c0_3, %c0_4], %2 {strides = array<i32>} : memref<128x128xf32, #tpu.memory_space<vmem>>, vector<128x128xf32>,
    %c0_5 = arith.constant 0 : index
    %c0_6 = arith.constant 0 : index
    %4 = vector.load %arg3[%c0_5, %c0_6] : memref<256x128xf32, #tpu.memory_space<vmem>>, vector<256x128xf32>
    %cst_7 = arith.constant dense<0.000000e+00> : vector<128x128xf32>
    %5 = tpu.matmul %0, %4, %cst_7 {dimension_numbers = #tpu.dot_dimension_numbers<[1], [0], [0], [1], [0, 0, 1, 1], [], []>} : vector<128x256xf32>, vector<256x128xf32>, vector<128x128xf32> -> vector<128x128xf32>
    %c0_8 = arith.constant 0 : index
    %c0_9 = arith.constant 0 : index
    %6 = vector.load %arg5[%c0_8, %c0_9] : memref<128x128xf32, #tpu.memory_space<vmem>>, vector<128x128xf32>
    tpu.vector_store %arg5[%c0_8, %c0_9], %5 {strides = array<i32>} : memref<128x128xf32, #tpu.memory_space<vmem>>, vector<128x128xf32>,
    return
  }
  func.func @transform_0(%arg0: i32) -> (i32, i32) {
    %c0_i32 = arith.constant 0 : i32
    %c0_i32_0 = arith.constant 0 : i32
    return %arg0, %c0_i32 : i32, i32
  }
  func.func @transform_1(%arg0: i32) -> (i32, i32) {
    %c0_i32 = arith.constant 0 : i32
    %c0_i32_0 = arith.constant 0 : i32
    %c0_i32_1 = arith.constant 0 : i32
    return %c0_i32, %c0_i32_0 : i32, i32
  }
  func.func @transform_2(%arg0: i32) -> (i32, i32) {
    %c0_i32 = arith.constant 0 : i32
    %c0_i32_0 = arith.constant 0 : i32
    %c0_i32_1 = arith.constant 0 : i32
    return %c0_i32, %c0_i32_0 : i32, i32
  }
  func.func @transform_3(%arg0: i32) -> (i32, i32) {
    %c0_i32 = arith.constant 0 : i32
    %c0_i32_0 = arith.constant 0 : i32
    return %arg0, %c0_i32 : i32, i32
  }
  func.func @transform_4(%arg0: i32) -> (i32, i32) {
    %c0_i32 = arith.constant 0 : i32
    %c0_i32_0 = arith.constant 0 : i32
    return %arg0, %c0_i32 : i32, i32
  }
}

module attributes {stable_mosaic.version = 11 : i64} {
  func.func @_projection_kernel(%arg0: i32, %arg1: memref<128x256xf32, #tpu.memory_space<vmem>>, %arg2: memref<256x128xf32, #tpu.memory_space<vmem>>, %arg3: memref<256x128xf32, #tpu.memory_space<vmem>>, %arg4: memref<128x128xf32, #tpu.memory_space<vmem>>, %arg5: memref<128x128xf32, #tpu.memory_space<vmem>>) attributes {dimension_semantics = [#tpu.dimension_semantics<parallel>], iteration_bounds = array<i64: 1>, scalar_prefetch = 0 : i64, scratch_operands = 0 : i64, tpu.core_type = #tpu.core_type<tc>, window_params = [{transform_indices = @transform_0, window_bounds = array<i64: 128, 256>}, {pipeline_mode = #tpu.pipeline_mode<synchronous>, transform_indices = @transform_1, window_bounds = array<i64: 256, 128>}, {pipeline_mode = #tpu.pipeline_mode<synchronous>, transform_indices = @transform_2, window_bounds = array<i64: 256, 128>}, {transform_indices = @transform_3, window_bounds = array<i64: 128, 128>}, {transform_indices = @transform_4, window_bounds = array<i64: 128, 128>}]} {
    %c0 = arith.constant 0 : index
    %c0_0 = arith.constant 0 : index
    %0 = vector.load %arg1[%c0, %c0_0] : memref<128x256xf32, #tpu.memory_space<vmem>>, vector<128x256xf32>
    %c0_1 = arith.constant 0 : index
    %c0_2 = arith.constant 0 : index
    %1 = vector.load %arg2[%c0_1, %c0_2] : memref<256x128xf32, #tpu.memory_space<vmem>>, vector<256x128xf32>
    %cst = arith.constant dense<0.000000e+00> : vector<128x128xf32>
    %2 = tpu.matmul %0, %1, %cst {dimension_numbers = #tpu.dot_dimension_numbers<[1], [0], [0], [1], [0, 0, 1, 1], [], []>} : vector<128x256xf32>, vector<256x128xf32>, vector<128x128xf32> -> vector<128x128xf32>
    %c0_3 = arith.constant 0 : index
    %c0_4 = arith.constant 0 : index
    %3 = vector.load %arg4[%c0_3, %c0_4] : memref<128x128xf32, #tpu.memory_space<vmem>>, vector<128x128xf32>
    tpu.vector_store %arg4[%c0_3, %c0_4], %2 {strides = array<i32>} : memref<128x128xf32, #tpu.memory_space<vmem>>, vector<128x128xf32>,
    %c0_5 = arith.constant 0 : index
    %c0_6 = arith.constant 0 : index
    %4 = vector.load %arg3[%c0_5, %c0_6] : memref<256x128xf32, #tpu.memory_space<vmem>>, vector<256x128xf32>
    %cst_7 = arith.constant dense<0.000000e+00> : vector<128x128xf32>
    %5 = tpu.matmul %0, %4, %cst_7 {dimension_numbers = #tpu.dot_dimension_numbers<[1], [0], [0], [1], [0, 0, 1, 1], [], []>} : vector<128x256xf32>, vector<256x128xf32>, vector<128x128xf32> -> vector<128x128xf32>
    %c0_8 = arith.constant 0 : index
    %c0_9 = arith.constant 0 : index
    %6 = vector.load %arg5[%c0_8, %c0_9] : memref<128x128xf32, #tpu.memory_space<vmem>>, vector<128x128xf32>
    tpu.vector_store %arg5[%c0_8, %c0_9], %5 {strides = array<i32>} : memref<128x128xf32, #tpu.memory_space<vmem>>, vector<128x128xf32>,
    return
  }
  func.func @transform_0(%arg0: i32) -> (i32, i32) {
    %c0_i32 = arith.constant 0 : i32
    %c0_i32_0 = arith.constant 0 : i32
    return %arg0, %c0_i32 : i32, i32
  }
  func.func @transform_1(%arg0: i32) -> (i32, i32) {
    %c0_i32 = arith.constant 0 : i32
    %c0_i32_0 = arith.constant 0 : i32
    %c0_i32_1 = arith.constant 0 : i32
    return %c0_i32, %c0_i32_0 : i32, i32
  }
  func.func @transform_2(%arg0: i32) -> (i32, i32) {
    %c0_i32 = arith.constant 0 : i32
    %c0_i32_0 = arith.constant 0 : i32
    %c0_i32_1 = arith.constant 0 : i32
    return %c0_i32, %c0_i32_0 : i32, i32
  }
  func.func @transform_3(%arg0: i32) -> (i32, i32) {
    %c0_i32 = arith.constant 0 : i32
    %c0_i32_0 = arith.constant 0 : i32
    return %arg0, %c0_i32 : i32, i32
  }
  func.func @transform_4(%arg0: i32) -> (i32, i32) {
    %c0_i32 = arith.constant 0 : i32
    %c0_i32_0 = arith.constant 0 : i32
    return %arg0, %c0_i32 : i32, i32
  }
}

</mosaic_0001>

<bundles_post_ra>
// kernel: tpu_custom_call.1
= control target key start
LH: loop header
LB: loop body
LE: loop exit
PB: predicated region body
PF: predicated region fallthrough
CT: control target
= control target key end

     0   :  { %10 = vsyncpa [#allocation3], 0  ;;  %s689_s0 = inlined_call_operand.hbm [shape: f32[128,256], index: 0, kind: input, shape index: {}]   ;;  %s690_s1 = inlined_call_operand.hbm [shape: f32[256,128], index: 1, kind: input, shape index: {}]   ;;  %s691_s2 = inlined_call_operand.hbm [shape: f32[256,128], index: 2, kind: input, shape index: {}]   ;;  %s692_s3 = inlined_call_operand.hbm [shape: f32[128,128], index: 3, kind: output, shape index: {0}]   ;;  %s693_s4 = inlined_call_operand.hbm [shape: f32[128,128], index: 4, kind: output, shape index: {1}]  }
   0x1   :  { %11 = vsyncpa [#allocation6], 0 }
   0x2   :  { %12 = vsyncpa [#allocation4], 0  ;;  %s31_s17 = sshll.u32 %s690_s1, 4  ;;  %s32_s17 = int_to_ptr.hbm [resolvable:$true] %s31_s17 }
   0x3   :  { %13 = vsyncpa [#allocation10], 0  ;;  %s628_s18 = smov [#allocation5]   ;;  %s18_s22 = sshll.u32 %s689_s0, 4  ;;  %s19_s22 = int_to_ptr.hbm [resolvable:$true] %s18_s22 }
   0x4   :  { %s33_s19 = sshll.u32 %s628_s18, 4  ;;  %s629_s23 = smov 128   ;;  %s34_s19 = int_to_ptr.vmem [resolvable:$true] %s33_s19 }
   0x5   :  { %s630_s24 = smov 8   ;;  %s631_s25 = smov [#allocation2]  }
   0x6   :  { %39 = dma.hbm_to_vmem [thread:$0]  %s32_s17, 4096, %s34_s19, [#allocation6], %s629_s23, %s629_s23, %s630_s24  }
   0x7   :  { %s20_s26 = sshll.u32 %s631_s25, 4  ;;  %s632_s1 = smov 256   ;;  %s21_s26 = int_to_ptr.vmem [resolvable:$true] %s20_s26 }
   0x8   :  { %s633_s27 = smov 16   ;;  %s44_s30 = sshll.u32 %s691_s2, 4  ;;  %s45_s30 = int_to_ptr.hbm [resolvable:$true] %s44_s30 }
   0x9   :  { %26 = dma.hbm_to_vmem [thread:$0]  %s19_s22, 4096, %s21_s26, [#allocation3], %s632_s1, %s632_s1, %s633_s27  }
   0xa   :  { %s634_s5 = smov [#allocation7]  }
   0xb   :  { %s46_s0 = sshll.u32 %s634_s5, 4  ;;  %s47_s0 = int_to_ptr.vmem [resolvable:$true] %s46_s0 }
   0xc   :  { %52 = dma.hbm_to_vmem [thread:$0]  %s45_s30, 4096, %s47_s0, [#allocation6], %s629_s23, %s629_s23, %s630_s24  }
   0xd   :  { %620 = dma.done.wait [#allocation3], 4096  }
   0xe   :  { %621 = vsyncadd [#allocation3], 4294963200 }
   0xf   :  { %622 = dma.done.wait [#allocation6], 8192  }
  0x10   :  { %623 = vsyncadd [#allocation6], 4294959104  ;;  %v290_v0 = vld [vmem:[#allocation7 + $0x78] sm:$0xff]  ;;  %v289_v2 = vld [vmem:[#allocation7 + $0x70] sm:$0xff]  ;;  %s635_s2 = smov [#allocation8]   ;;  %s459_s9 = sshll.u32 %s692_s3, 4  ;;  %s460_s9 = int_to_ptr.hbm [resolvable:$true] %s459_s9 }
  0x11   :  { %v306_v1 = vld [vmem:[#allocation7 + $0xf8] sm:$0xff]  ;;  %307 = vmatpush.msra.mxu2 %v290_v0  ;;  %v305_v3 = vld [vmem:[#allocation7 + $0xf0] sm:$0xff]  ;;  %v288_v4 = vld [vmem:[#allocation7 + $0x68] sm:$0xff]  ;;  %s457_s6 = sshll.u32 %s635_s2, 4  ;;  %s636_s10 = smov [#allocation9]   ;;  %s458_s6 = int_to_ptr.vmem [resolvable:$true] %s457_s6 }
  0x12   :  { %372 = vmatpush.msra.mxu3 %v306_v1  ;;  %v304_v5 = vld [vmem:[#allocation7 + $0xe8] sm:$0xff]  ;;  %v112_v6 = vld [vmem:[#allocation5 + $0x78] sm:$0xff]  ;;  %v111_v8 = vld [vmem:[#allocation5 + $0x70] sm:$0xff]  ;;  %s470_s11 = sshll.u32 %s636_s10, 4  ;;  %s472_s14 = sshll.u32 %s693_s4, 4  ;;  %s471_s11 = int_to_ptr.vmem [resolvable:$true] %s470_s11  ;;  %s473_s14 = int_to_ptr.hbm [resolvable:$true] %s472_s14 }
  0x13   :  { %v128_v7 = vld [vmem:[#allocation5 + $0xf8] sm:$0xff]  ;;  %308 = vmatpush.msra.mxu2 %v289_v2  ;;  %v127_v9 = vld [vmem:[#allocation5 + $0xf0] sm:$0xff]  ;;  %129 = vmatpush.msra.mxu0 %v112_v6  ;;  %v287_v10 = vld [vmem:[#allocation7 + $0x60] sm:$0xff] }
  0x14   :  { %373 = vmatpush.msra.mxu3 %v305_v3  ;;  %194 = vmatpush.msra.mxu1 %v128_v7  ;;  %v303_v11 = vld [vmem:[#allocation7 + $0xe0] sm:$0xff]  ;;  %v110_v12 = vld [vmem:[#allocation5 + $0x68] sm:$0xff]  ;;  %v286_v14 = vld [vmem:[#allocation7 + $0x58] sm:$0xff] }
  0x15   :  { %309 = vmatpush.msra.mxu2 %v288_v4  ;;  %v126_v13 = vld [vmem:[#allocation5 + $0xe8] sm:$0xff]  ;;  %130 = vmatpush.msra.mxu0 %v111_v8  ;;  %v302_v15 = vld [vmem:[#allocation7 + $0xd8] sm:$0xff]  ;;  %v109_v16 = vld [vmem:[#allocation5 + $0x60] sm:$0xff] }
  0x16   :  { %374 = vmatpush.msra.mxu3 %v304_v5  ;;  %195 = vmatpush.msra.mxu1 %v127_v9  ;;  %v125_v17 = vld [vmem:[#allocation5 + $0xe0] sm:$0xff]  ;;  %v285_v18 = vld [vmem:[#allocation7 + $0x50] sm:$0xff]  ;;  %v108_v20 = vld [vmem:[#allocation5 + $0x58] sm:$0xff] }
  0x17   :  { %310 = vmatpush.msra.mxu2 %v287_v10  ;;  %131 = vmatpush.msra.mxu0 %v110_v12  ;;  %v301_v19 = vld [vmem:[#allocation7 + $0xd0] sm:$0xff]  ;;  %v124_v21 = vld [vmem:[#allocation5 + $0xd8] sm:$0xff]  ;;  %v284_v22 = vld [vmem:[#allocation7 + $0x48] sm:$0xff] }
  0x18   :  { %375 = vmatpush.msra.mxu3 %v303_v11  ;;  %196 = vmatpush.msra.mxu1 %v126_v13  ;;  %v300_v23 = vld [vmem:[#allocation7 + $0xc8] sm:$0xff]  ;;  %v107_v24 = vld [vmem:[#allocation5 + $0x50] sm:$0xff]  ;;  %v283_v26 = vld [vmem:[#allocation7 + $0x40] sm:$0xff] }
  0x19   :  { %311 = vmatpush.msra.mxu2 %v286_v14  ;;  %132 = vmatpush.msra.mxu0 %v109_v16  ;;  %v123_v25 = vld [vmem:[#allocation5 + $0xd0] sm:$0xff]  ;;  %v299_v27 = vld [vmem:[#allocation7 + $0xc0] sm:$0xff]  ;;  %v106_v28 = vld [vmem:[#allocation5 + $0x48] sm:$0xff] }
  0x1a   :  { %376 = vmatpush.msra.mxu3 %v302_v15  ;;  %197 = vmatpush.msra.mxu1 %v125_v17  ;;  %v122_v29 = vld [vmem:[#allocation5 + $0xc8] sm:$0xff]  ;;  %v282_v30 = vld [vmem:[#allocation7 + $0x38] sm:$0xff]  ;;  %v105_v32 = vld [vmem:[#allocation5 + $0x40] sm:$0xff] }
  0x1b   :  { %312 = vmatpush.msra.mxu2 %v285_v18  ;;  %133 = vmatpush.msra.mxu0 %v108_v20  ;;  %v298_v31 = vld [vmem:[#allocation7 + $0xb8] sm:$0xff]  ;;  %v121_v33 = vld [vmem:[#allocation5 + $0xc0] sm:$0xff]  ;;  %v281_v34 = vld [vmem:[#allocation7 + $0x30] sm:$0xff] }
  0x1c   :  { %377 = vmatpush.msra.mxu3 %v301_v19  ;;  %198 = vmatpush.msra.mxu1 %v124_v21  ;;  %v297_v35 = vld [vmem:[#allocation7 + $0xb0] sm:$0xff]  ;;  %v104_v36 = vld [vmem:[#allocation5 + $0x38] sm:$0xff]  ;;  %v280_v38 = vld [vmem:[#allocation7 + $0x28] sm:$0xff] }
  0x1d   :  { %313 = vmatpush.msra.mxu2 %v284_v22  ;;  %134 = vmatpush.msra.mxu0 %v107_v24  ;;  %v120_v37 = vld [vmem:[#allocation5 + $0xb8] sm:$0xff]  ;;  %v296_v39 = vld [vmem:[#allocation7 + $0xa8] sm:$0xff]  ;;  %v103_v40 = vld [vmem:[#allocation5 + $0x30] sm:$0xff] }
  0x1e   :  { %378 = vmatpush.msra.mxu3 %v300_v23  ;;  %199 = vmatpush.msra.mxu1 %v123_v25  ;;  %v119_v41 = vld [vmem:[#allocation5 + $0xb0] sm:$0xff]  ;;  %v279_v42 = vld [vmem:[#allocation7 + $0x20] sm:$0xff]  ;;  %v102_v44 = vld [vmem:[#allocation5 + $0x28] sm:$0xff] }
  0x1f   :  { %314 = vmatpush.msra.mxu2 %v283_v26  ;;  %135 = vmatpush.msra.mxu0 %v106_v28  ;;  %v295_v43 = vld [vmem:[#allocation7 + $0xa0] sm:$0xff]  ;;  %v118_v45 = vld [vmem:[#allocation5 + $0xa8] sm:$0xff]  ;;  %v278_v46 = vld [vmem:[#allocation7 + $0x18] sm:$0xff] }
  0x20   :  { %379 = vmatpush.msra.mxu3 %v299_v27  ;;  %200 = vmatpush.msra.mxu1 %v122_v29  ;;  %v294_v47 = vld [vmem:[#allocation7 + $0x98] sm:$0xff]  ;;  %v101_v48 = vld [vmem:[#allocation5 + $0x20] sm:$0xff]  ;;  %v277_v50 = vld [vmem:[#allocation7 + $0x10] sm:$0xff] }
  0x21   :  { %315 = vmatpush.msra.mxu2 %v282_v30  ;;  %136 = vmatpush.msra.mxu0 %v105_v32  ;;  %v117_v49 = vld [vmem:[#allocation5 + $0xa0] sm:$0xff]  ;;  %v293_v51 = vld [vmem:[#allocation7 + $0x90] sm:$0xff]  ;;  %v100_v52 = vld [vmem:[#allocation5 + $0x18] sm:$0xff] }
  0x22   :  { %380 = vmatpush.msra.mxu3 %v298_v31  ;;  %201 = vmatpush.msra.mxu1 %v121_v33  ;;  %v116_v53 = vld [vmem:[#allocation5 + $0x98] sm:$0xff]  ;;  %v276_v54 = vld [vmem:[#allocation7 + $0x8] sm:$0xff]  ;;  %v99_v56 = vld [vmem:[#allocation5 + $0x10] sm:$0xff] }
  0x23   :  { %316 = vmatpush.msra.mxu2 %v281_v34  ;;  %137 = vmatpush.msra.mxu0 %v104_v36  ;;  %v292_v55 = vld [vmem:[#allocation7 + $0x88] sm:$0xff]  ;;  %v115_v57 = vld [vmem:[#allocation5 + $0x90] sm:$0xff]  ;;  %v275_v58 = vld [vmem:[#allocation7] sm:$0xff] }
  0x24   :  { %381 = vmatpush.msra.mxu3 %v297_v35  ;;  %202 = vmatpush.msra.mxu1 %v120_v37  ;;  %v291_v59 = vld [vmem:[#allocation7 + $0x80] sm:$0xff]  ;;  %v66_v61 = vld [vmem:[#allocation2 + $0x8] sm:$0xff]  ;;  %v67_v2 = vld [vmem:[#allocation2 + $0x10] sm:$0xff] }
  0x25   :  { %317 = vmatpush.msra.mxu2 %v280_v38  ;;  %138 = vmatpush.msra.mxu0 %v103_v40  ;;  %v65_v60 = vld [vmem:[#allocation2] sm:$0xff]  ;;  %v98_v62 = vld [vmem:[#allocation5 + $0x8] sm:$0xff]  ;;  %v68_v3 = vld [vmem:[#allocation2 + $0x18] sm:$0xff] }
  0x26   :  { %382 = vmatpush.msra.mxu3 %v296_v39  ;;  %203 = vmatpush.msra.mxu1 %v119_v41  ;;  %v114_v63 = vld [vmem:[#allocation5 + $0x88] sm:$0xff]  ;;  %v97_v0 = vld [vmem:[#allocation5] sm:$0xff]  ;;  %v71_v6 = vld [vmem:[#allocation2 + $0x30] sm:$0xff] }
  0x27   :  { %318 = vmatpush.msra.mxu2 %v279_v42  ;;  %139 = vmatpush.msra.mxu0 %v102_v44  ;;  %v113_v1 = vld [vmem:[#allocation5 + $0x80] sm:$0xff]  ;;  %v70_v5 = vld [vmem:[#allocation2 + $0x28] sm:$0xff]  ;;  %v72_v7 = vld [vmem:[#allocation2 + $0x38] sm:$0xff] }
  0x28   :  { %383 = vmatpush.msra.mxu3 %v295_v43  ;;  %204 = vmatpush.msra.mxu1 %v118_v45  ;;  %v69_v4 = vld [vmem:[#allocation2 + $0x20] sm:$0xff]  ;;  %v74_v9 = vld [vmem:[#allocation2 + $0x48] sm:$0xff]  ;;  %v75_v10 = vld [vmem:[#allocation2 + $0x50] sm:$0xff] }
  0x29   :  { %319 = vmatpush.msra.mxu2 %v278_v46  ;;  %140 = vmatpush.msra.mxu0 %v101_v48  ;;  %v73_v8 = vld [vmem:[#allocation2 + $0x40] sm:$0xff]  ;;  %v76_v11 = vld [vmem:[#allocation2 + $0x58] sm:$0xff]  ;;  %v78_v13 = vld [vmem:[#allocation2 + $0x68] sm:$0xff] }
  0x2a   :  { %384 = vmatpush.msra.mxu3 %v294_v47  ;;  %205 = vmatpush.msra.mxu1 %v117_v49  ;;  %v77_v12 = vld [vmem:[#allocation2 + $0x60] sm:$0xff]  ;;  %v79_v14 = vld [vmem:[#allocation2 + $0x70] sm:$0xff]  ;;  %v80_v15 = vld [vmem:[#allocation2 + $0x78] sm:$0xff] }
  0x2b   :  { %320 = vmatpush.msra.mxu2 %v277_v50  ;;  %141 = vmatpush.msra.mxu0 %v100_v52  ;;  %v81_v16 = vld [vmem:[#allocation2 + $0x80] sm:$0xff]  ;;  %v82_v17 = vld [vmem:[#allocation2 + $0x88] sm:$0xff]  ;;  %v83_v18 = vld [vmem:[#allocation2 + $0x90] sm:$0xff] }
  0x2c   :  { %385 = vmatpush.msra.mxu3 %v293_v51  ;;  %206 = vmatpush.msra.mxu1 %v116_v53  ;;  %v84_v19 = vld [vmem:[#allocation2 + $0x98] sm:$0xff]  ;;  %v85_v20 = vld [vmem:[#allocation2 + $0xa0] sm:$0xff]  ;;  %v86_v21 = vld [vmem:[#allocation2 + $0xa8] sm:$0xff] }
  0x2d   :  { %321 = vmatpush.msra.mxu2 %v276_v54  ;;  %142 = vmatpush.msra.mxu0 %v99_v56  ;;  %v87_v22 = vld [vmem:[#allocation2 + $0xb0] sm:$0xff]  ;;  %v88_v23 = vld [vmem:[#allocation2 + $0xb8] sm:$0xff]  ;;  %v89_v24 = vld [vmem:[#allocation2 + $0xc0] sm:$0xff] }
  0x2e   :  { %386 = vmatpush.msra.mxu3 %v292_v55  ;;  %207 = vmatpush.msra.mxu1 %v115_v57  ;;  %v90_v25 = vld [vmem:[#allocation2 + $0xc8] sm:$0xff]  ;;  %v91_v26 = vld [vmem:[#allocation2 + $0xd0] sm:$0xff]  ;;  %v92_v27 = vld [vmem:[#allocation2 + $0xd8] sm:$0xff] }
  0x2f   :  { %322 = vmatpush.msra.mxu2 %v275_v58  ;;  %143 = vmatpush.msra.mxu0 %v98_v62  ;;  %v93_v28 = vld [vmem:[#allocation2 + $0xe0] sm:$0xff]  ;;  %v94_v29 = vld [vmem:[#allocation2 + $0xe8] sm:$0xff]  ;;  %v95_v30 = vld [vmem:[#allocation2 + $0xf0] sm:$0xff] }
  0x30   :  { %387 = vmatpush.msra.mxu3 %v291_v59  ;;  %323 = vmatmul.f32.vlgmr.msra.gmra.mxu2 %v65_v60  ;;  %v96_v31 = vld [vmem:[#allocation2 + $0xf8] sm:$0xff] }
  0x31   :  { %388 = vmatmul.f32.vlgmr.msra.gmra.mxu3 %v66_v61  ;;  %208 = vmatpush.msra.mxu1 %v114_v63 }
  0x32   :  { %144 = vmatpush.msra.mxu0 %v97_v0 }
  0x33   :  { %209 = vmatpush.msra.mxu1 %v113_v1  ;;  %145 = vmatmul.f32.vlgmr.msra.gmra.mxu0 %v65_v60 }
  0x34   :  { %210 = vmatmul.f32.vlgmr.msra.gmra.mxu1 %v66_v61 }
  0x38   :  { %326 = vmatmul.f32.gmra.mxu2 %v67_v2 }
  0x39   :  { %391 = vmatmul.f32.gmra.mxu3 %v68_v3 }
  0x3b   :  { %148 = vmatmul.f32.gmra.mxu0 %v67_v2 }
  0x3c   :  { %213 = vmatmul.f32.gmra.mxu1 %v68_v3 }
  0x40   :  { %329 = vmatmul.f32.gmra.mxu2 %v69_v4 }
  0x41   :  { %394 = vmatmul.f32.gmra.mxu3 %v70_v5 }
  0x43   :  { %151 = vmatmul.f32.gmra.mxu0 %v69_v4 }
  0x44   :  { %216 = vmatmul.f32.gmra.mxu1 %v70_v5 }
  0x48   :  { %332 = vmatmul.f32.gmra.mxu2 %v71_v6 }
  0x49   :  { %397 = vmatmul.f32.gmra.mxu3 %v72_v7 }
  0x4b   :  { %154 = vmatmul.f32.gmra.mxu0 %v71_v6 }
  0x4c   :  { %219 = vmatmul.f32.gmra.mxu1 %v72_v7 }
  0x50   :  { %335 = vmatmul.f32.gmra.mxu2 %v73_v8 }
  0x51   :  { %400 = vmatmul.f32.gmra.mxu3 %v74_v9 }
  0x53   :  { %157 = vmatmul.f32.gmra.mxu0 %v73_v8 }
  0x54   :  { %222 = vmatmul.f32.gmra.mxu1 %v74_v9 }
  0x58   :  { %338 = vmatmul.f32.gmra.mxu2 %v75_v10 }
  0x59   :  { %403 = vmatmul.f32.gmra.mxu3 %v76_v11 }
  0x5b   :  { %160 = vmatmul.f32.gmra.mxu0 %v75_v10 }
  0x5c   :  { %225 = vmatmul.f32.gmra.mxu1 %v76_v11 }
  0x60   :  { %341 = vmatmul.f32.gmra.mxu2 %v77_v12 }
  0x61   :  { %406 = vmatmul.f32.gmra.mxu3 %v78_v13 }
  0x63   :  { %163 = vmatmul.f32.gmra.mxu0 %v77_v12 }
  0x64   :  { %228 = vmatmul.f32.gmra.mxu1 %v78_v13 }
  0x68   :  { %344 = vmatmul.f32.gmra.mxu2 %v79_v14 }
  0x69   :  { %409 = vmatmul.f32.gmra.mxu3 %v80_v15 }
  0x6b   :  { %166 = vmatmul.f32.gmra.mxu0 %v79_v14 }
  0x6c   :  { %231 = vmatmul.f32.gmra.mxu1 %v80_v15 }
  0x70   :  { %347 = vmatmul.f32.gmra.mxu2 %v81_v16 }
  0x71   :  { %412 = vmatmul.f32.gmra.mxu3 %v82_v17 }
  0x73   :  { %169 = vmatmul.f32.gmra.mxu0 %v81_v16 }
  0x74   :  { %234 = vmatmul.f32.gmra.mxu1 %v82_v17 }
  0x78   :  { %350 = vmatmul.f32.gmra.mxu2 %v83_v18 }
  0x79   :  { %415 = vmatmul.f32.gmra.mxu3 %v84_v19 }
  0x7b   :  { %172 = vmatmul.f32.gmra.mxu0 %v83_v18 }
  0x7c   :  { %237 = vmatmul.f32.gmra.mxu1 %v84_v19 }
  0x80   :  { %353 = vmatmul.f32.gmra.mxu2 %v85_v20 }
  0x81   :  { %418 = vmatmul.f32.gmra.mxu3 %v86_v21 }
  0x83   :  { %175 = vmatmul.f32.gmra.mxu0 %v85_v20 }
  0x84   :  { %240 = vmatmul.f32.gmra.mxu1 %v86_v21 }
  0x88   :  { %356 = vmatmul.f32.gmra.mxu2 %v87_v22 }
  0x89   :  { %421 = vmatmul.f32.gmra.mxu3 %v88_v23 }
  0x8b   :  { %178 = vmatmul.f32.gmra.mxu0 %v87_v22 }
  0x8c   :  { %243 = vmatmul.f32.gmra.mxu1 %v88_v23 }
  0x90   :  { %359 = vmatmul.f32.gmra.mxu2 %v89_v24 }
  0x91   :  { %424 = vmatmul.f32.gmra.mxu3 %v90_v25 }
  0x93   :  { %181 = vmatmul.f32.gmra.mxu0 %v89_v24 }
  0x94   :  { %246 = vmatmul.f32.gmra.mxu1 %v90_v25 }
  0x98   :  { %362 = vmatmul.f32.gmra.mxu2 %v91_v26 }
  0x99   :  { %427 = vmatmul.f32.gmra.mxu3 %v92_v27 }
  0x9b   :  { %184 = vmatmul.f32.gmra.mxu0 %v91_v26 }
  0x9c   :  { %249 = vmatmul.f32.gmra.mxu1 %v92_v27 }
  0xa0   :  { %365 = vmatmul.f32.gmra.mxu2 %v93_v28 }
  0xa1   :  { %430 = vmatmul.f32.gmra.mxu3 %v94_v29 }
  0xa3   :  { %187 = vmatmul.f32.gmra.mxu0 %v93_v28 }
  0xa4   :  { %252 = vmatmul.f32.gmra.mxu1 %v94_v29 }
  0xa8   :  { %368 = vmatmul.f32.gmra.mxu2 %v95_v30 }
  0xa9   :  { %433 = vmatmul.f32.gmra.mxu3 %v96_v31 }
  0xab   :  { %190 = vmatmul.f32.gmra.mxu0 %v95_v30 }
  0xac   :  { %255 = vmatmul.f32.gmra.mxu1 %v96_v31 }
  0xb0   :  { %v146_v32 = vpop.f32.mrf.mxu0 }
  0xb1   :  { %v211_v33 = vpop.f32.mrf.mxu1 }
  0xb2   :  { %v212_v34 = vadd.f32 %v211_v33, %v146_v32 }
  0xb3   :  { %v324_v35 = vpop.f32.mrf.mxu2 }
  0xb4   :  { %v389_v36 = vpop.f32.mrf.mxu3  ;;  %259 = vst [vmem:[#allocation8] sm:$0xff] %v212_v34 }
  0xb5   :  { %v390_v37 = vadd.f32 %v389_v36, %v324_v35 }
  0xb7   :  { %437 = vst [vmem:[#allocation9] sm:$0xff] %v390_v37 }
  0xb8   :  { %v149_v38 = vpop.f32.mrf.mxu0 }
  0xb9   :  { %v214_v39 = vpop.f32.mrf.mxu1 }
  0xba   :  { %v215_v40 = vadd.f32 %v214_v39, %v149_v38 }
  0xbb   :  { %v327_v41 = vpop.f32.mrf.mxu2 }
  0xbc   :  { %v392_v42 = vpop.f32.mrf.mxu3  ;;  %260 = vst [vmem:[#allocation8 + $0x8] sm:$0xff] %v215_v40 }
  0xbd   :  { %v393_v43 = vadd.f32 %v392_v42, %v327_v41 }
  0xbf   :  { %438 = vst [vmem:[#allocation9 + $0x8] sm:$0xff] %v393_v43 }
  0xc0   :  { %v152_v44 = vpop.f32.mrf.mxu0 }
  0xc1   :  { %v217_v45 = vpop.f32.mrf.mxu1 }
  0xc2   :  { %v218_v46 = vadd.f32 %v217_v45, %v152_v44 }
  0xc3   :  { %v330_v47 = vpop.f32.mrf.mxu2 }
  0xc4   :  { %v395_v48 = vpop.f32.mrf.mxu3  ;;  %261 = vst [vmem:[#allocation8 + $0x10] sm:$0xff] %v218_v46 }
  0xc5   :  { %v396_v49 = vadd.f32 %v395_v48, %v330_v47 }
  0xc7   :  { %439 = vst [vmem:[#allocation9 + $0x10] sm:$0xff] %v396_v49 }
  0xc8   :  { %v155_v50 = vpop.f32.mrf.mxu0 }
  0xc9   :  { %v220_v51 = vpop.f32.mrf.mxu1 }
  0xca   :  { %v221_v52 = vadd.f32 %v220_v51, %v155_v50 }
  0xcb   :  { %v333_v53 = vpop.f32.mrf.mxu2 }
  0xcc   :  { %v398_v54 = vpop.f32.mrf.mxu3  ;;  %262 = vst [vmem:[#allocation8 + $0x18] sm:$0xff] %v221_v52 }
  0xcd   :  { %v399_v55 = vadd.f32 %v398_v54, %v333_v53 }
  0xcf   :  { %440 = vst [vmem:[#allocation9 + $0x18] sm:$0xff] %v399_v55 }
  0xd0   :  { %v158_v56 = vpop.f32.mrf.mxu0 }
  0xd1   :  { %v223_v57 = vpop.f32.mrf.mxu1 }
  0xd2   :  { %v224_v58 = vadd.f32 %v223_v57, %v158_v56 }
  0xd3   :  { %v336_v59 = vpop.f32.mrf.mxu2 }
  0xd4   :  { %v401_v60 = vpop.f32.mrf.mxu3  ;;  %263 = vst [vmem:[#allocation8 + $0x20] sm:$0xff] %v224_v58 }
  0xd5   :  { %v402_v61 = vadd.f32 %v401_v60, %v336_v59 }
  0xd7   :  { %441 = vst [vmem:[#allocation9 + $0x20] sm:$0xff] %v402_v61 }
  0xd8   :  { %v161_v62 = vpop.f32.mrf.mxu0 }
  0xd9   :  { %v226_v63 = vpop.f32.mrf.mxu1 }
  0xda   :  { %v227_v0 = vadd.f32 %v226_v63, %v161_v62 }
  0xdb   :  { %v339_v1 = vpop.f32.mrf.mxu2 }
  0xdc   :  { %v404_v2 = vpop.f32.mrf.mxu3  ;;  %264 = vst [vmem:[#allocation8 + $0x28] sm:$0xff] %v227_v0 }
  0xdd   :  { %v405_v3 = vadd.f32 %v404_v2, %v339_v1 }
  0xdf   :  { %442 = vst [vmem:[#allocation9 + $0x28] sm:$0xff] %v405_v3 }
  0xe0   :  { %v164_v4 = vpop.f32.mrf.mxu0 }
  0xe1   :  { %v229_v5 = vpop.f32.mrf.mxu1 }
  0xe2   :  { %v230_v6 = vadd.f32 %v229_v5, %v164_v4 }
  0xe3   :  { %v342_v7 = vpop.f32.mrf.mxu2 }
  0xe4   :  { %v407_v8 = vpop.f32.mrf.mxu3  ;;  %265 = vst [vmem:[#allocation8 + $0x30] sm:$0xff] %v230_v6 }
  0xe5   :  { %v408_v9 = vadd.f32 %v407_v8, %v342_v7 }
  0xe7   :  { %443 = vst [vmem:[#allocation9 + $0x30] sm:$0xff] %v408_v9 }
  0xe8   :  { %v167_v10 = vpop.f32.mrf.mxu0 }
  0xe9   :  { %v232_v11 = vpop.f32.mrf.mxu1 }
  0xea   :  { %v233_v12 = vadd.f32 %v232_v11, %v167_v10 }
  0xeb   :  { %v345_v13 = vpop.f32.mrf.mxu2 }
  0xec   :  { %v410_v14 = vpop.f32.mrf.mxu3  ;;  %266 = vst [vmem:[#allocation8 + $0x38] sm:$0xff] %v233_v12 }
  0xed   :  { %v411_v15 = vadd.f32 %v410_v14, %v345_v13 }
  0xef   :  { %444 = vst [vmem:[#allocation9 + $0x38] sm:$0xff] %v411_v15 }
  0xf0   :  { %v170_v16 = vpop.f32.mrf.mxu0 }
  0xf1   :  { %v235_v17 = vpop.f32.mrf.mxu1 }
  0xf2   :  { %v236_v18 = vadd.f32 %v235_v17, %v170_v16 }
  0xf3   :  { %v348_v19 = vpop.f32.mrf.mxu2 }
  0xf4   :  { %v413_v20 = vpop.f32.mrf.mxu3  ;;  %267 = vst [vmem:[#allocation8 + $0x40] sm:$0xff] %v236_v18 }
  0xf5   :  { %v414_v21 = vadd.f32 %v413_v20, %v348_v19 }
  0xf7   :  { %445 = vst [vmem:[#allocation9 + $0x40] sm:$0xff] %v414_v21 }
  0xf8   :  { %v173_v22 = vpop.f32.mrf.mxu0 }
  0xf9   :  { %v238_v23 = vpop.f32.mrf.mxu1 }
  0xfa   :  { %v239_v24 = vadd.f32 %v238_v23, %v173_v22 }
  0xfb   :  { %v351_v25 = vpop.f32.mrf.mxu2 }
  0xfc   :  { %v416_v26 = vpop.f32.mrf.mxu3  ;;  %268 = vst [vmem:[#allocation8 + $0x48] sm:$0xff] %v239_v24 }
  0xfd   :  { %v417_v27 = vadd.f32 %v416_v26, %v351_v25 }
  0xff   :  { %446 = vst [vmem:[#allocation9 + $0x48] sm:$0xff] %v417_v27 }
 0x100   :  { %v176_v28 = vpop.f32.mrf.mxu0 }
 0x101   :  { %v241_v29 = vpop.f32.mrf.mxu1 }
 0x102   :  { %v242_v30 = vadd.f32 %v241_v29, %v176_v28 }
 0x103   :  { %v354_v31 = vpop.f32.mrf.mxu2 }
 0x104   :  { %v419_v32 = vpop.f32.mrf.mxu3  ;;  %269 = vst [vmem:[#allocation8 + $0x50] sm:$0xff] %v242_v30 }
 0x105   :  { %v420_v33 = vadd.f32 %v419_v32, %v354_v31 }
 0x107   :  { %447 = vst [vmem:[#allocation9 + $0x50] sm:$0xff] %v420_v33 }
 0x108   :  { %v179_v34 = vpop.f32.mrf.mxu0 }
 0x109   :  { %v244_v35 = vpop.f32.mrf.mxu1 }
 0x10a   :  { %v245_v36 = vadd.f32 %v244_v35, %v179_v34 }
 0x10b   :  { %v357_v37 = vpop.f32.mrf.mxu2 }
 0x10c   :  { %v422_v38 = vpop.f32.mrf.mxu3  ;;  %270 = vst [vmem:[#allocation8 + $0x58] sm:$0xff] %v245_v36 }
 0x10d   :  { %v423_v39 = vadd.f32 %v422_v38, %v357_v37 }
 0x10f   :  { %448 = vst [vmem:[#allocation9 + $0x58] sm:$0xff] %v423_v39 }
 0x110   :  { %v182_v40 = vpop.f32.mrf.mxu0 }
 0x111   :  { %v247_v41 = vpop.f32.mrf.mxu1 }
 0x112   :  { %v248_v42 = vadd.f32 %v247_v41, %v182_v40 }
 0x113   :  { %v360_v43 = vpop.f32.mrf.mxu2 }
 0x114   :  { %v425_v44 = vpop.f32.mrf.mxu3  ;;  %271 = vst [vmem:[#allocation8 + $0x60] sm:$0xff] %v248_v42 }
 0x115   :  { %v426_v45 = vadd.f32 %v425_v44, %v360_v43 }
 0x117   :  { %449 = vst [vmem:[#allocation9 + $0x60] sm:$0xff] %v426_v45 }
 0x118   :  { %v185_v46 = vpop.f32.mrf.mxu0 }
 0x119   :  { %v250_v47 = vpop.f32.mrf.mxu1 }
 0x11a   :  { %v251_v48 = vadd.f32 %v250_v47, %v185_v46 }
 0x11b   :  { %v363_v49 = vpop.f32.mrf.mxu2 }
 0x11c   :  { %v428_v50 = vpop.f32.mrf.mxu3  ;;  %272 = vst [vmem:[#allocation8 + $0x68] sm:$0xff] %v251_v48 }
 0x11d   :  { %v429_v51 = vadd.f32 %v428_v50, %v363_v49 }
 0x11f   :  { %450 = vst [vmem:[#allocation9 + $0x68] sm:$0xff] %v429_v51 }
 0x120   :  { %v188_v52 = vpop.f32.mrf.mxu0 }
 0x121   :  { %v253_v53 = vpop.f32.mrf.mxu1 }
 0x122   :  { %v254_v54 = vadd.f32 %v253_v53, %v188_v52 }
 0x123   :  { %v366_v55 = vpop.f32.mrf.mxu2 }
 0x124   :  { %v431_v56 = vpop.f32.mrf.mxu3  ;;  %273 = vst [vmem:[#allocation8 + $0x70] sm:$0xff] %v254_v54 }
 0x125   :  { %v432_v57 = vadd.f32 %v431_v56, %v366_v55 }
 0x127   :  { %451 = vst [vmem:[#allocation9 + $0x70] sm:$0xff] %v432_v57 }
 0x128   :  { %v191_v58 = vpop.f32.mrf.mxu0 }
 0x129   :  { %v256_v59 = vpop.f32.mrf.mxu1 }
 0x12a   :  { %v257_v60 = vadd.f32 %v256_v59, %v191_v58 }
 0x12b   :  { %v369_v61 = vpop.f32.mrf.mxu2 }
 0x12c   :  { %v434_v62 = vpop.f32.mrf.mxu3  ;;  %274 = vst [vmem:[#allocation8 + $0x78] sm:$0xff] %v257_v60 }
 0x12d   :  { %v435_v63 = vadd.f32 %v434_v62, %v369_v61  ;;  %465 = dma.vmem_to_hbm [thread:$0]  %s458_s6, 2048, %s460_s9, [#allocation4], %s629_s23, %s629_s23, %s630_s24  }
 0x12f   :  { %452 = vst [vmem:[#allocation9 + $0x78] sm:$0xff] %v435_v63 }
 0x130   :  { %478 = dma.vmem_to_hbm [thread:$0]  %s471_s11, 2048, %s473_s14, [#allocation10], %s629_s23, %s629_s23, %s630_s24  }
 0x131   :  { %624 = dma.done.wait [#allocation4], 2048  }
 0x132   :  { %625 = vsyncadd [#allocation4], 4294965248 }
 0x133   :  { %626 = dma.done.wait [#allocation10], 2048  }
 0x134   :  { %627 = vsyncadd [#allocation10], 4294965248 }
 0x135   :  { %487 = vsyncpa [#allocation3], 1 }
 0x136   :  { %488 = vsyncpa [#allocation6], 1 }
 0x137   :  { %489 = vsyncpa [#allocation4], 1 }
 0x138   :  { %490 = vsyncpa [#allocation10], 1 }

// kernel: tpu_custom_call.1
= control target key start
LH: loop header
LB: loop body
LE: loop exit
PB: predicated region body
PF: predicated region fallthrough
CT: control target
= control target key end

     0   :  { %10 = vsyncpa [#allocation3], 0  ;;  %s689_s0 = inlined_call_operand.hbm [shape: f32[128,256], index: 0, kind: input, shape index: {}]   ;;  %s690_s1 = inlined_call_operand.hbm [shape: f32[256,128], index: 1, kind: input, shape index: {}]   ;;  %s691_s2 = inlined_call_operand.hbm [shape: f32[256,128], index: 2, kind: input, shape index: {}]   ;;  %s692_s3 = inlined_call_operand.hbm [shape: f32[128,128], index: 3, kind: output, shape index: {0}]   ;;  %s693_s4 = inlined_call_operand.hbm [shape: f32[128,128], index: 4, kind: output, shape index: {1}]  }
   0x1   :  { %11 = vsyncpa [#allocation6], 0 }
   0x2   :  { %12 = vsyncpa [#allocation4], 0  ;;  %s31_s17 = sshll.u32 %s690_s1, 4  ;;  %s32_s17 = int_to_ptr.hbm [resolvable:$true] %s31_s17 }
   0x3   :  { %13 = vsyncpa [#allocation10], 0  ;;  %s628_s18 = smov [#allocation5]   ;;  %s18_s22 = sshll.u32 %s689_s0, 4  ;;  %s19_s22 = int_to_ptr.hbm [resolvable:$true] %s18_s22 }
   0x4   :  { %s33_s19 = sshll.u32 %s628_s18, 4  ;;  %s629_s23 = smov 128   ;;  %s34_s19 = int_to_ptr.vmem [resolvable:$true] %s33_s19 }
   0x5   :  { %s630_s24 = smov 8   ;;  %s631_s25 = smov [#allocation2]  }
   0x6   :  { %39 = dma.hbm_to_vmem [thread:$0]  %s32_s17, 4096, %s34_s19, [#allocation6], %s629_s23, %s629_s23, %s630_s24  }
   0x7   :  { %s20_s26 = sshll.u32 %s631_s25, 4  ;;  %s632_s1 = smov 256   ;;  %s21_s26 = int_to_ptr.vmem [resolvable:$true] %s20_s26 }
   0x8   :  { %s633_s27 = smov 16   ;;  %s44_s30 = sshll.u32 %s691_s2, 4  ;;  %s45_s30 = int_to_ptr.hbm [resolvable:$true] %s44_s30 }
   0x9   :  { %26 = dma.hbm_to_vmem [thread:$0]  %s19_s22, 4096, %s21_s26, [#allocation3], %s632_s1, %s632_s1, %s633_s27  }
   0xa   :  { %s634_s5 = smov [#allocation7]  }
   0xb   :  { %s46_s0 = sshll.u32 %s634_s5, 4  ;;  %s47_s0 = int_to_ptr.vmem [resolvable:$true] %s46_s0 }
   0xc   :  { %52 = dma.hbm_to_vmem [thread:$0]  %s45_s30, 4096, %s47_s0, [#allocation6], %s629_s23, %s629_s23, %s630_s24  }
   0xd   :  { %620 = dma.done.wait [#allocation3], 4096  }
   0xe   :  { %621 = vsyncadd [#allocation3], 4294963200 }
   0xf   :  { %622 = dma.done.wait [#allocation6], 8192  }
  0x10   :  { %623 = vsyncadd [#allocation6], 4294959104  ;;  %v290_v0 = vld [vmem:[#allocation7 + $0x78] sm:$0xff]  ;;  %v289_v2 = vld [vmem:[#allocation7 + $0x70] sm:$0xff]  ;;  %s635_s2 = smov [#allocation8]   ;;  %s459_s9 = sshll.u32 %s692_s3, 4  ;;  %s460_s9 = int_to_ptr.hbm [resolvable:$true] %s459_s9 }
  0x11   :  { %v306_v1 = vld [vmem:[#allocation7 + $0xf8] sm:$0xff]  ;;  %307 = vmatpush.msra.mxu2 %v290_v0  ;;  %v305_v3 = vld [vmem:[#allocation7 + $0xf0] sm:$0xff]  ;;  %v288_v4 = vld [vmem:[#allocation7 + $0x68] sm:$0xff]  ;;  %s457_s6 = sshll.u32 %s635_s2, 4  ;;  %s636_s10 = smov [#allocation9]   ;;  %s458_s6 = int_to_ptr.vmem [resolvable:$true] %s457_s6 }
  0x12   :  { %372 = vmatpush.msra.mxu3 %v306_v1  ;;  %v304_v5 = vld [vmem:[#allocation7 + $0xe8] sm:$0xff]  ;;  %v112_v6 = vld [vmem:[#allocation5 + $0x78] sm:$0xff]  ;;  %v111_v8 = vld [vmem:[#allocation5 + $0x70] sm:$0xff]  ;;  %s470_s11 = sshll.u32 %s636_s10, 4  ;;  %s472_s14 = sshll.u32 %s693_s4, 4  ;;  %s471_s11 = int_to_ptr.vmem [resolvable:$true] %s470_s11  ;;  %s473_s14 = int_to_ptr.hbm [resolvable:$true] %s472_s14 }
  0x13   :  { %v128_v7 = vld [vmem:[#allocation5 + $0xf8] sm:$0xff]  ;;  %308 = vmatpush.msra.mxu2 %v289_v2  ;;  %v127_v9 = vld [vmem:[#allocation5 + $0xf0] sm:$0xff]  ;;  %129 = vmatpush.msra.mxu0 %v112_v6  ;;  %v287_v10 = vld [vmem:[#allocation7 + $0x60] sm:$0xff] }
  0x14   :  { %373 = vmatpush.msra.mxu3 %v305_v3  ;;  %194 = vmatpush.msra.mxu1 %v128_v7  ;;  %v303_v11 = vld [vmem:[#allocation7 + $0xe0] sm:$0xff]  ;;  %v110_v12 = vld [vmem:[#allocation5 + $0x68] sm:$0xff]  ;;  %v286_v14 = vld [vmem:[#allocation7 + $0x58] sm:$0xff] }
  0x15   :  { %309 = vmatpush.msra.mxu2 %v288_v4  ;;  %v126_v13 = vld [vmem:[#allocation5 + $0xe8] sm:$0xff]  ;;  %130 = vmatpush.msra.mxu0 %v111_v8  ;;  %v302_v15 = vld [vmem:[#allocation7 + $0xd8] sm:$0xff]  ;;  %v109_v16 = vld [vmem:[#allocation5 + $0x60] sm:$0xff] }
  0x16   :  { %374 = vmatpush.msra.mxu3 %v304_v5  ;;  %195 = vmatpush.msra.mxu1 %v127_v9  ;;  %v125_v17 = vld [vmem:[#allocation5 + $0xe0] sm:$0xff]  ;;  %v285_v18 = vld [vmem:[#allocation7 + $0x50] sm:$0xff]  ;;  %v108_v20 = vld [vmem:[#allocation5 + $0x58] sm:$0xff] }
  0x17   :  { %310 = vmatpush.msra.mxu2 %v287_v10  ;;  %131 = vmatpush.msra.mxu0 %v110_v12  ;;  %v301_v19 = vld [vmem:[#allocation7 + $0xd0] sm:$0xff]  ;;  %v124_v21 = vld [vmem:[#allocation5 + $0xd8] sm:$0xff]  ;;  %v284_v22 = vld [vmem:[#allocation7 + $0x48] sm:$0xff] }
  0x18   :  { %375 = vmatpush.msra.mxu3 %v303_v11  ;;  %196 = vmatpush.msra.mxu1 %v126_v13  ;;  %v300_v23 = vld [vmem:[#allocation7 + $0xc8] sm:$0xff]  ;;  %v107_v24 = vld [vmem:[#allocation5 + $0x50] sm:$0xff]  ;;  %v283_v26 = vld [vmem:[#allocation7 + $0x40] sm:$0xff] }
  0x19   :  { %311 = vmatpush.msra.mxu2 %v286_v14  ;;  %132 = vmatpush.msra.mxu0 %v109_v16  ;;  %v123_v25 = vld [vmem:[#allocation5 + $0xd0] sm:$0xff]  ;;  %v299_v27 = vld [vmem:[#allocation7 + $0xc0] sm:$0xff]  ;;  %v106_v28 = vld [vmem:[#allocation5 + $0x48] sm:$0xff] }
  0x1a   :  { %376 = vmatpush.msra.mxu3 %v302_v15  ;;  %197 = vmatpush.msra.mxu1 %v125_v17  ;;  %v122_v29 = vld [vmem:[#allocation5 + $0xc8] sm:$0xff]  ;;  %v282_v30 = vld [vmem:[#allocation7 + $0x38] sm:$0xff]  ;;  %v105_v32 = vld [vmem:[#allocation5 + $0x40] sm:$0xff] }
  0x1b   :  { %312 = vmatpush.msra.mxu2 %v285_v18  ;;  %133 = vmatpush.msra.mxu0 %v108_v20  ;;  %v298_v31 = vld [vmem:[#allocation7 + $0xb8] sm:$0xff]  ;;  %v121_v33 = vld [vmem:[#allocation5 + $0xc0] sm:$0xff]  ;;  %v281_v34 = vld [vmem:[#allocation7 + $0x30] sm:$0xff] }
  0x1c   :  { %377 = vmatpush.msra.mxu3 %v301_v19  ;;  %198 = vmatpush.msra.mxu1 %v124_v21  ;;  %v297_v35 = vld [vmem:[#allocation7 + $0xb0] sm:$0xff]  ;;  %v104_v36 = vld [vmem:[#allocation5 + $0x38] sm:$0xff]  ;;  %v280_v38 = vld [vmem:[#allocation7 + $0x28] sm:$0xff] }
  0x1d   :  { %313 = vmatpush.msra.mxu2 %v284_v22  ;;  %134 = vmatpush.msra.mxu0 %v107_v24  ;;  %v120_v37 = vld [vmem:[#allocation5 + $0xb8] sm:$0xff]  ;;  %v296_v39 = vld [vmem:[#allocation7 + $0xa8] sm:$0xff]  ;;  %v103_v40 = vld [vmem:[#allocation5 + $0x30] sm:$0xff] }
  0x1e   :  { %378 = vmatpush.msra.mxu3 %v300_v23  ;;  %199 = vmatpush.msra.mxu1 %v123_v25  ;;  %v119_v41 = vld [vmem:[#allocation5 + $0xb0] sm:$0xff]  ;;  %v279_v42 = vld [vmem:[#allocation7 + $0x20] sm:$0xff]  ;;  %v102_v44 = vld [vmem:[#allocation5 + $0x28] sm:$0xff] }
  0x1f   :  { %314 = vmatpush.msra.mxu2 %v283_v26  ;;  %135 = vmatpush.msra.mxu0 %v106_v28  ;;  %v295_v43 = vld [vmem:[#allocation7 + $0xa0] sm:$0xff]  ;;  %v118_v45 = vld [vmem:[#allocation5 + $0xa8] sm:$0xff]  ;;  %v278_v46 = vld [vmem:[#allocation7 + $0x18] sm:$0xff] }
  0x20   :  { %379 = vmatpush.msra.mxu3 %v299_v27  ;;  %200 = vmatpush.msra.mxu1 %v122_v29  ;;  %v294_v47 = vld [vmem:[#allocation7 + $0x98] sm:$0xff]  ;;  %v101_v48 = vld [vmem:[#allocation5 + $0x20] sm:$0xff]  ;;  %v277_v50 = vld [vmem:[#allocation7 + $0x10] sm:$0xff] }
  0x21   :  { %315 = vmatpush.msra.mxu2 %v282_v30  ;;  %136 = vmatpush.msra.mxu0 %v105_v32  ;;  %v117_v49 = vld [vmem:[#allocation5 + $0xa0] sm:$0xff]  ;;  %v293_v51 = vld [vmem:[#allocation7 + $0x90] sm:$0xff]  ;;  %v100_v52 = vld [vmem:[#allocation5 + $0x18] sm:$0xff] }
  0x22   :  { %380 = vmatpush.msra.mxu3 %v298_v31  ;;  %201 = vmatpush.msra.mxu1 %v121_v33  ;;  %v116_v53 = vld [vmem:[#allocation5 + $0x98] sm:$0xff]  ;;  %v276_v54 = vld [vmem:[#allocation7 + $0x8] sm:$0xff]  ;;  %v99_v56 = vld [vmem:[#allocation5 + $0x10] sm:$0xff] }
  0x23   :  { %316 = vmatpush.msra.mxu2 %v281_v34  ;;  %137 = vmatpush.msra.mxu0 %v104_v36  ;;  %v292_v55 = vld [vmem:[#allocation7 + $0x88] sm:$0xff]  ;;  %v115_v57 = vld [vmem:[#allocation5 + $0x90] sm:$0xff]  ;;  %v275_v58 = vld [vmem:[#allocation7] sm:$0xff] }
  0x24   :  { %381 = vmatpush.msra.mxu3 %v297_v35  ;;  %202 = vmatpush.msra.mxu1 %v120_v37  ;;  %v291_v59 = vld [vmem:[#allocation7 + $0x80] sm:$0xff]  ;;  %v66_v61 = vld [vmem:[#allocation2 + $0x8] sm:$0xff]  ;;  %v67_v2 = vld [vmem:[#allocation2 + $0x10] sm:$0xff] }
  0x25   :  { %317 = vmatpush.msra.mxu2 %v280_v38  ;;  %138 = vmatpush.msra.mxu0 %v103_v40  ;;  %v65_v60 = vld [vmem:[#allocation2] sm:$0xff]  ;;  %v98_v62 = vld [vmem:[#allocation5 + $0x8] sm:$0xff]  ;;  %v68_v3 = vld [vmem:[#allocation2 + $0x18] sm:$0xff] }
  0x26   :  { %382 = vmatpush.msra.mxu3 %v296_v39  ;;  %203 = vmatpush.msra.mxu1 %v119_v41  ;;  %v114_v63 = vld [vmem:[#allocation5 + $0x88] sm:$0xff]  ;;  %v97_v0 = vld [vmem:[#allocation5] sm:$0xff]  ;;  %v71_v6 = vld [vmem:[#allocation2 + $0x30] sm:$0xff] }
  0x27   :  { %318 = vmatpush.msra.mxu2 %v279_v42  ;;  %139 = vmatpush.msra.mxu0 %v102_v44  ;;  %v113_v1 = vld [vmem:[#allocation5 + $0x80] sm:$0xff]  ;;  %v70_v5 = vld [vmem:[#allocation2 + $0x28] sm:$0xff]  ;;  %v72_v7 = vld [vmem:[#allocation2 + $0x38] sm:$0xff] }
  0x28   :  { %383 = vmatpush.msra.mxu3 %v295_v43  ;;  %204 = vmatpush.msra.mxu1 %v118_v45  ;;  %v69_v4 = vld [vmem:[#allocation2 + $0x20] sm:$0xff]  ;;  %v74_v9 = vld [vmem:[#allocation2 + $0x48] sm:$0xff]  ;;  %v75_v10 = vld [vmem:[#allocation2 + $0x50] sm:$0xff] }
  0x29   :  { %319 = vmatpush.msra.mxu2 %v278_v46  ;;  %140 = vmatpush.msra.mxu0 %v101_v48  ;;  %v73_v8 = vld [vmem:[#allocation2 + $0x40] sm:$0xff]  ;;  %v76_v11 = vld [vmem:[#allocation2 + $0x58] sm:$0xff]  ;;  %v78_v13 = vld [vmem:[#allocation2 + $0x68] sm:$0xff] }
  0x2a   :  { %384 = vmatpush.msra.mxu3 %v294_v47  ;;  %205 = vmatpush.msra.mxu1 %v117_v49  ;;  %v77_v12 = vld [vmem:[#allocation2 + $0x60] sm:$0xff]  ;;  %v79_v14 = vld [vmem:[#allocation2 + $0x70] sm:$0xff]  ;;  %v80_v15 = vld [vmem:[#allocation2 + $0x78] sm:$0xff] }
  0x2b   :  { %320 = vmatpush.msra.mxu2 %v277_v50  ;;  %141 = vmatpush.msra.mxu0 %v100_v52  ;;  %v81_v16 = vld [vmem:[#allocation2 + $0x80] sm:$0xff]  ;;  %v82_v17 = vld [vmem:[#allocation2 + $0x88] sm:$0xff]  ;;  %v83_v18 = vld [vmem:[#allocation2 + $0x90] sm:$0xff] }
  0x2c   :  { %385 = vmatpush.msra.mxu3 %v293_v51  ;;  %206 = vmatpush.msra.mxu1 %v116_v53  ;;  %v84_v19 = vld [vmem:[#allocation2 + $0x98] sm:$0xff]  ;;  %v85_v20 = vld [vmem:[#allocation2 + $0xa0] sm:$0xff]  ;;  %v86_v21 = vld [vmem:[#allocation2 + $0xa8] sm:$0xff] }
  0x2d   :  { %321 = vmatpush.msra.mxu2 %v276_v54  ;;  %142 = vmatpush.msra.mxu0 %v99_v56  ;;  %v87_v22 = vld [vmem:[#allocation2 + $0xb0] sm:$0xff]  ;;  %v88_v23 = vld [vmem:[#allocation2 + $0xb8] sm:$0xff]  ;;  %v89_v24 = vld [vmem:[#allocation2 + $0xc0] sm:$0xff] }
  0x2e   :  { %386 = vmatpush.msra.mxu3 %v292_v55  ;;  %207 = vmatpush.msra.mxu1 %v115_v57  ;;  %v90_v25 = vld [vmem:[#allocation2 + $0xc8] sm:$0xff]  ;;  %v91_v26 = vld [vmem:[#allocation2 + $0xd0] sm:$0xff]  ;;  %v92_v27 = vld [vmem:[#allocation2 + $0xd8] sm:$0xff] }
  0x2f   :  { %322 = vmatpush.msra.mxu2 %v275_v58  ;;  %143 = vmatpush.msra.mxu0 %v98_v62  ;;  %v93_v28 = vld [vmem:[#allocation2 + $0xe0] sm:$0xff]  ;;  %v94_v29 = vld [vmem:[#allocation2 + $0xe8] sm:$0xff]  ;;  %v95_v30 = vld [vmem:[#allocation2 + $0xf0] sm:$0xff] }
  0x30   :  { %387 = vmatpush.msra.mxu3 %v291_v59  ;;  %323 = vmatmul.f32.vlgmr.msra.gmra.mxu2 %v65_v60  ;;  %v96_v31 = vld [vmem:[#allocation2 + $0xf8] sm:$0xff] }
  0x31   :  { %388 = vmatmul.f32.vlgmr.msra.gmra.mxu3 %v66_v61  ;;  %208 = vmatpush.msra.mxu1 %v114_v63 }
  0x32   :  { %144 = vmatpush.msra.mxu0 %v97_v0 }
  0x33   :  { %209 = vmatpush.msra.mxu1 %v113_v1  ;;  %145 = vmatmul.f32.vlgmr.msra.gmra.mxu0 %v65_v60 }
  0x34   :  { %210 = vmatmul.f32.vlgmr.msra.gmra.mxu1 %v66_v61 }
  0x38   :  { %326 = vmatmul.f32.gmra.mxu2 %v67_v2 }
  0x39   :  { %391 = vmatmul.f32.gmra.mxu3 %v68_v3 }
  0x3b   :  { %148 = vmatmul.f32.gmra.mxu0 %v67_v2 }
  0x3c   :  { %213 = vmatmul.f32.gmra.mxu1 %v68_v3 }
  0x40   :  { %329 = vmatmul.f32.gmra.mxu2 %v69_v4 }
  0x41   :  { %394 = vmatmul.f32.gmra.mxu3 %v70_v5 }
  0x43   :  { %151 = vmatmul.f32.gmra.mxu0 %v69_v4 }
  0x44   :  { %216 = vmatmul.f32.gmra.mxu1 %v70_v5 }
  0x48   :  { %332 = vmatmul.f32.gmra.mxu2 %v71_v6 }
  0x49   :  { %397 = vmatmul.f32.gmra.mxu3 %v72_v7 }
  0x4b   :  { %154 = vmatmul.f32.gmra.mxu0 %v71_v6 }
  0x4c   :  { %219 = vmatmul.f32.gmra.mxu1 %v72_v7 }
  0x50   :  { %335 = vmatmul.f32.gmra.mxu2 %v73_v8 }
  0x51   :  { %400 = vmatmul.f32.gmra.mxu3 %v74_v9 }
  0x53   :  { %157 = vmatmul.f32.gmra.mxu0 %v73_v8 }
  0x54   :  { %222 = vmatmul.f32.gmra.mxu1 %v74_v9 }
  0x58   :  { %338 = vmatmul.f32.gmra.mxu2 %v75_v10 }
  0x59   :  { %403 = vmatmul.f32.gmra.mxu3 %v76_v11 }
  0x5b   :  { %160 = vmatmul.f32.gmra.mxu0 %v75_v10 }
  0x5c   :  { %225 = vmatmul.f32.gmra.mxu1 %v76_v11 }
  0x60   :  { %341 = vmatmul.f32.gmra.mxu2 %v77_v12 }
  0x61   :  { %406 = vmatmul.f32.gmra.mxu3 %v78_v13 }
  0x63   :  { %163 = vmatmul.f32.gmra.mxu0 %v77_v12 }
  0x64   :  { %228 = vmatmul.f32.gmra.mxu1 %v78_v13 }
  0x68   :  { %344 = vmatmul.f32.gmra.mxu2 %v79_v14 }
  0x69   :  { %409 = vmatmul.f32.gmra.mxu3 %v80_v15 }
  0x6b   :  { %166 = vmatmul.f32.gmra.mxu0 %v79_v14 }
  0x6c   :  { %231 = vmatmul.f32.gmra.mxu1 %v80_v15 }
  0x70   :  { %347 = vmatmul.f32.gmra.mxu2 %v81_v16 }
  0x71   :  { %412 = vmatmul.f32.gmra.mxu3 %v82_v17 }
  0x73   :  { %169 = vmatmul.f32.gmra.mxu0 %v81_v16 }
  0x74   :  { %234 = vmatmul.f32.gmra.mxu1 %v82_v17 }
  0x78   :  { %350 = vmatmul.f32.gmra.mxu2 %v83_v18 }
  0x79   :  { %415 = vmatmul.f32.gmra.mxu3 %v84_v19 }
  0x7b   :  { %172 = vmatmul.f32.gmra.mxu0 %v83_v18 }
  0x7c   :  { %237 = vmatmul.f32.gmra.mxu1 %v84_v19 }
  0x80   :  { %353 = vmatmul.f32.gmra.mxu2 %v85_v20 }
  0x81   :  { %418 = vmatmul.f32.gmra.mxu3 %v86_v21 }
  0x83   :  { %175 = vmatmul.f32.gmra.mxu0 %v85_v20 }
  0x84   :  { %240 = vmatmul.f32.gmra.mxu1 %v86_v21 }
  0x88   :  { %356 = vmatmul.f32.gmra.mxu2 %v87_v22 }
  0x89   :  { %421 = vmatmul.f32.gmra.mxu3 %v88_v23 }
  0x8b   :  { %178 = vmatmul.f32.gmra.mxu0 %v87_v22 }
  0x8c   :  { %243 = vmatmul.f32.gmra.mxu1 %v88_v23 }
  0x90   :  { %359 = vmatmul.f32.gmra.mxu2 %v89_v24 }
  0x91   :  { %424 = vmatmul.f32.gmra.mxu3 %v90_v25 }
  0x93   :  { %181 = vmatmul.f32.gmra.mxu0 %v89_v24 }
  0x94   :  { %246 = vmatmul.f32.gmra.mxu1 %v90_v25 }
  0x98   :  { %362 = vmatmul.f32.gmra.mxu2 %v91_v26 }
  0x99   :  { %427 = vmatmul.f32.gmra.mxu3 %v92_v27 }
  0x9b   :  { %184 = vmatmul.f32.gmra.mxu0 %v91_v26 }
  0x9c   :  { %249 = vmatmul.f32.gmra.mxu1 %v92_v27 }
  0xa0   :  { %365 = vmatmul.f32.gmra.mxu2 %v93_v28 }
  0xa1   :  { %430 = vmatmul.f32.gmra.mxu3 %v94_v29 }
  0xa3   :  { %187 = vmatmul.f32.gmra.mxu0 %v93_v28 }
  0xa4   :  { %252 = vmatmul.f32.gmra.mxu1 %v94_v29 }
  0xa8   :  { %368 = vmatmul.f32.gmra.mxu2 %v95_v30 }
  0xa9   :  { %433 = vmatmul.f32.gmra.mxu3 %v96_v31 }
  0xab   :  { %190 = vmatmul.f32.gmra.mxu0 %v95_v30 }
  0xac   :  { %255 = vmatmul.f32.gmra.mxu1 %v96_v31 }
  0xb0   :  { %v146_v32 = vpop.f32.mrf.mxu0 }
  0xb1   :  { %v211_v33 = vpop.f32.mrf.mxu1 }
  0xb2   :  { %v212_v34 = vadd.f32 %v211_v33, %v146_v32 }
  0xb3   :  { %v324_v35 = vpop.f32.mrf.mxu2 }
  0xb4   :  { %v389_v36 = vpop.f32.mrf.mxu3  ;;  %259 = vst [vmem:[#allocation8] sm:$0xff] %v212_v34 }
  0xb5   :  { %v390_v37 = vadd.f32 %v389_v36, %v324_v35 }
  0xb7   :  { %437 = vst [vmem:[#allocation9] sm:$0xff] %v390_v37 }
  0xb8   :  { %v149_v38 = vpop.f32.mrf.mxu0 }
  0xb9   :  { %v214_v39 = vpop.f32.mrf.mxu1 }
  0xba   :  { %v215_v40 = vadd.f32 %v214_v39, %v149_v38 }
  0xbb   :  { %v327_v41 = vpop.f32.mrf.mxu2 }
  0xbc   :  { %v392_v42 = vpop.f32.mrf.mxu3  ;;  %260 = vst [vmem:[#allocation8 + $0x8] sm:$0xff] %v215_v40 }
  0xbd   :  { %v393_v43 = vadd.f32 %v392_v42, %v327_v41 }
  0xbf   :  { %438 = vst [vmem:[#allocation9 + $0x8] sm:$0xff] %v393_v43 }
  0xc0   :  { %v152_v44 = vpop.f32.mrf.mxu0 }
  0xc1   :  { %v217_v45 = vpop.f32.mrf.mxu1 }
  0xc2   :  { %v218_v46 = vadd.f32 %v217_v45, %v152_v44 }
  0xc3   :  { %v330_v47 = vpop.f32.mrf.mxu2 }
  0xc4   :  { %v395_v48 = vpop.f32.mrf.mxu3  ;;  %261 = vst [vmem:[#allocation8 + $0x10] sm:$0xff] %v218_v46 }
  0xc5   :  { %v396_v49 = vadd.f32 %v395_v48, %v330_v47 }
  0xc7   :  { %439 = vst [vmem:[#allocation9 + $0x10] sm:$0xff] %v396_v49 }
  0xc8   :  { %v155_v50 = vpop.f32.mrf.mxu0 }
  0xc9   :  { %v220_v51 = vpop.f32.mrf.mxu1 }
  0xca   :  { %v221_v52 = vadd.f32 %v220_v51, %v155_v50 }
  0xcb   :  { %v333_v53 = vpop.f32.mrf.mxu2 }
  0xcc   :  { %v398_v54 = vpop.f32.mrf.mxu3  ;;  %262 = vst [vmem:[#allocation8 + $0x18] sm:$0xff] %v221_v52 }
  0xcd   :  { %v399_v55 = vadd.f32 %v398_v54, %v333_v53 }
  0xcf   :  { %440 = vst [vmem:[#allocation9 + $0x18] sm:$0xff] %v399_v55 }
  0xd0   :  { %v158_v56 = vpop.f32.mrf.mxu0 }
  0xd1   :  { %v223_v57 = vpop.f32.mrf.mxu1 }
  0xd2   :  { %v224_v58 = vadd.f32 %v223_v57, %v158_v56 }
  0xd3   :  { %v336_v59 = vpop.f32.mrf.mxu2 }
  0xd4   :  { %v401_v60 = vpop.f32.mrf.mxu3  ;;  %263 = vst [vmem:[#allocation8 + $0x20] sm:$0xff] %v224_v58 }
  0xd5   :  { %v402_v61 = vadd.f32 %v401_v60, %v336_v59 }
  0xd7   :  { %441 = vst [vmem:[#allocation9 + $0x20] sm:$0xff] %v402_v61 }
  0xd8   :  { %v161_v62 = vpop.f32.mrf.mxu0 }
  0xd9   :  { %v226_v63 = vpop.f32.mrf.mxu1 }
  0xda   :  { %v227_v0 = vadd.f32 %v226_v63, %v161_v62 }
  0xdb   :  { %v339_v1 = vpop.f32.mrf.mxu2 }
  0xdc   :  { %v404_v2 = vpop.f32.mrf.mxu3  ;;  %264 = vst [vmem:[#allocation8 + $0x28] sm:$0xff] %v227_v0 }
  0xdd   :  { %v405_v3 = vadd.f32 %v404_v2, %v339_v1 }
  0xdf   :  { %442 = vst [vmem:[#allocation9 + $0x28] sm:$0xff] %v405_v3 }
  0xe0   :  { %v164_v4 = vpop.f32.mrf.mxu0 }
  0xe1   :  { %v229_v5 = vpop.f32.mrf.mxu1 }
  0xe2   :  { %v230_v6 = vadd.f32 %v229_v5, %v164_v4 }
  0xe3   :  { %v342_v7 = vpop.f32.mrf.mxu2 }
  0xe4   :  { %v407_v8 = vpop.f32.mrf.mxu3  ;;  %265 = vst [vmem:[#allocation8 + $0x30] sm:$0xff] %v230_v6 }
  0xe5   :  { %v408_v9 = vadd.f32 %v407_v8, %v342_v7 }
  0xe7   :  { %443 = vst [vmem:[#allocation9 + $0x30] sm:$0xff] %v408_v9 }
  0xe8   :  { %v167_v10 = vpop.f32.mrf.mxu0 }
  0xe9   :  { %v232_v11 = vpop.f32.mrf.mxu1 }
  0xea   :  { %v233_v12 = vadd.f32 %v232_v11, %v167_v10 }
  0xeb   :  { %v345_v13 = vpop.f32.mrf.mxu2 }
  0xec   :  { %v410_v14 = vpop.f32.mrf.mxu3  ;;  %266 = vst [vmem:[#allocation8 + $0x38] sm:$0xff] %v233_v12 }
  0xed   :  { %v411_v15 = vadd.f32 %v410_v14, %v345_v13 }
  0xef   :  { %444 = vst [vmem:[#allocation9 + $0x38] sm:$0xff] %v411_v15 }
  0xf0   :  { %v170_v16 = vpop.f32.mrf.mxu0 }
  0xf1   :  { %v235_v17 = vpop.f32.mrf.mxu1 }
  0xf2   :  { %v236_v18 = vadd.f32 %v235_v17, %v170_v16 }
  0xf3   :  { %v348_v19 = vpop.f32.mrf.mxu2 }
  0xf4   :  { %v413_v20 = vpop.f32.mrf.mxu3  ;;  %267 = vst [vmem:[#allocation8 + $0x40] sm:$0xff] %v236_v18 }
  0xf5   :  { %v414_v21 = vadd.f32 %v413_v20, %v348_v19 }
  0xf7   :  { %445 = vst [vmem:[#allocation9 + $0x40] sm:$0xff] %v414_v21 }
  0xf8   :  { %v173_v22 = vpop.f32.mrf.mxu0 }
  0xf9   :  { %v238_v23 = vpop.f32.mrf.mxu1 }
  0xfa   :  { %v239_v24 = vadd.f32 %v238_v23, %v173_v22 }
  0xfb   :  { %v351_v25 = vpop.f32.mrf.mxu2 }
  0xfc   :  { %v416_v26 = vpop.f32.mrf.mxu3  ;;  %268 = vst [vmem:[#allocation8 + $0x48] sm:$0xff] %v239_v24 }
  0xfd   :  { %v417_v27 = vadd.f32 %v416_v26, %v351_v25 }
  0xff   :  { %446 = vst [vmem:[#allocation9 + $0x48] sm:$0xff] %v417_v27 }
 0x100   :  { %v176_v28 = vpop.f32.mrf.mxu0 }
 0x101   :  { %v241_v29 = vpop.f32.mrf.mxu1 }
 0x102   :  { %v242_v30 = vadd.f32 %v241_v29, %v176_v28 }
 0x103   :  { %v354_v31 = vpop.f32.mrf.mxu2 }
 0x104   :  { %v419_v32 = vpop.f32.mrf.mxu3  ;;  %269 = vst [vmem:[#allocation8 + $0x50] sm:$0xff] %v242_v30 }
 0x105   :  { %v420_v33 = vadd.f32 %v419_v32, %v354_v31 }
 0x107   :  { %447 = vst [vmem:[#allocation9 + $0x50] sm:$0xff] %v420_v33 }
 0x108   :  { %v179_v34 = vpop.f32.mrf.mxu0 }
 0x109   :  { %v244_v35 = vpop.f32.mrf.mxu1 }
 0x10a   :  { %v245_v36 = vadd.f32 %v244_v35, %v179_v34 }
 0x10b   :  { %v357_v37 = vpop.f32.mrf.mxu2 }
 0x10c   :  { %v422_v38 = vpop.f32.mrf.mxu3  ;;  %270 = vst [vmem:[#allocation8 + $0x58] sm:$0xff] %v245_v36 }
 0x10d   :  { %v423_v39 = vadd.f32 %v422_v38, %v357_v37 }
 0x10f   :  { %448 = vst [vmem:[#allocation9 + $0x58] sm:$0xff] %v423_v39 }
 0x110   :  { %v182_v40 = vpop.f32.mrf.mxu0 }
 0x111   :  { %v247_v41 = vpop.f32.mrf.mxu1 }
 0x112   :  { %v248_v42 = vadd.f32 %v247_v41, %v182_v40 }
 0x113   :  { %v360_v43 = vpop.f32.mrf.mxu2 }
 0x114   :  { %v425_v44 = vpop.f32.mrf.mxu3  ;;  %271 = vst [vmem:[#allocation8 + $0x60] sm:$0xff] %v248_v42 }
 0x115   :  { %v426_v45 = vadd.f32 %v425_v44, %v360_v43 }
 0x117   :  { %449 = vst [vmem:[#allocation9 + $0x60] sm:$0xff] %v426_v45 }
 0x118   :  { %v185_v46 = vpop.f32.mrf.mxu0 }
 0x119   :  { %v250_v47 = vpop.f32.mrf.mxu1 }
 0x11a   :  { %v251_v48 = vadd.f32 %v250_v47, %v185_v46 }
 0x11b   :  { %v363_v49 = vpop.f32.mrf.mxu2 }
 0x11c   :  { %v428_v50 = vpop.f32.mrf.mxu3  ;;  %272 = vst [vmem:[#allocation8 + $0x68] sm:$0xff] %v251_v48 }
 0x11d   :  { %v429_v51 = vadd.f32 %v428_v50, %v363_v49 }
 0x11f   :  { %450 = vst [vmem:[#allocation9 + $0x68] sm:$0xff] %v429_v51 }
 0x120   :  { %v188_v52 = vpop.f32.mrf.mxu0 }
 0x121   :  { %v253_v53 = vpop.f32.mrf.mxu1 }
 0x122   :  { %v254_v54 = vadd.f32 %v253_v53, %v188_v52 }
 0x123   :  { %v366_v55 = vpop.f32.mrf.mxu2 }
 0x124   :  { %v431_v56 = vpop.f32.mrf.mxu3  ;;  %273 = vst [vmem:[#allocation8 + $0x70] sm:$0xff] %v254_v54 }
 0x125   :  { %v432_v57 = vadd.f32 %v431_v56, %v366_v55 }
 0x127   :  { %451 = vst [vmem:[#allocation9 + $0x70] sm:$0xff] %v432_v57 }
 0x128   :  { %v191_v58 = vpop.f32.mrf.mxu0 }
 0x129   :  { %v256_v59 = vpop.f32.mrf.mxu1 }
 0x12a   :  { %v257_v60 = vadd.f32 %v256_v59, %v191_v58 }
 0x12b   :  { %v369_v61 = vpop.f32.mrf.mxu2 }
 0x12c   :  { %v434_v62 = vpop.f32.mrf.mxu3  ;;  %274 = vst [vmem:[#allocation8 + $0x78] sm:$0xff] %v257_v60 }
 0x12d   :  { %v435_v63 = vadd.f32 %v434_v62, %v369_v61  ;;  %465 = dma.vmem_to_hbm [thread:$0]  %s458_s6, 2048, %s460_s9, [#allocation4], %s629_s23, %s629_s23, %s630_s24  }
 0x12f   :  { %452 = vst [vmem:[#allocation9 + $0x78] sm:$0xff] %v435_v63 }
 0x130   :  { %478 = dma.vmem_to_hbm [thread:$0]  %s471_s11, 2048, %s473_s14, [#allocation10], %s629_s23, %s629_s23, %s630_s24  }
 0x131   :  { %624 = dma.done.wait [#allocation4], 2048  }
 0x132   :  { %625 = vsyncadd [#allocation4], 4294965248 }
 0x133   :  { %626 = dma.done.wait [#allocation10], 2048  }
 0x134   :  { %627 = vsyncadd [#allocation10], 4294965248 }
 0x135   :  { %487 = vsyncpa [#allocation3], 1 }
 0x136   :  { %488 = vsyncpa [#allocation6], 1 }
 0x137   :  { %489 = vsyncpa [#allocation4], 1 }
 0x138   :  { %490 = vsyncpa [#allocation10], 1 }

</bundles_post_ra>
